<compile_context>
chip_gen: v6e
topology: v6e:2x2x1
jax: 0.10.0
libtpu: 0.0.40
codegen_flags: <defaults>
</compile_context>

<pallas_src>
import functools
import math

import jax
import jax.numpy as jnp
from jax.experimental import pallas as pl
from jax.experimental.pallas import tpu as pltpu

# ----------------------------------------------------------------------------
# Small synthetic configuration (the real AST uses D=768, 12 layers, 12 heads,
# 1024x128 spectrograms; semantics are identical, dims are scaled down).
# ----------------------------------------------------------------------------
B = 2              # batch
NUM_SAMPLES = 2080 # raw audio samples per example
WIN, HOP = 64, 32  # framing for the synthetic "processor"
T_FRAMES = (NUM_SAMPLES - WIN) // HOP + 1   # 64 time frames  (real AST: 1024)
MEL = 32                                    # mel bins         (real AST: 128)
PATCH, STRIDE = 16, 10                      # patch embedding conv kernel / stride
F_DIM = (MEL - PATCH) // STRIDE + 1         # 2
T_DIM = (T_FRAMES - PATCH) // STRIDE + 1    # 5
NUM_PATCHES = F_DIM * T_DIM                 # 10
SEQ = NUM_PATCHES + 2                       # + [CLS] + [DIST] tokens
D = 256                                     # hidden size      (real AST: 768)
HEADS = 4
DH = D // HEADS
MLP = 512                                   # intermediate     (real AST: 3072)
LAYERS = 2                                  # encoder layers   (real AST: 12)
NB_CLASSES = 10
NC_PAD = 128                                # classifier N padded to a lane-dense 128
LN_EPS = 1e-12
ATTN_SCALE = 1.0 / math.sqrt(DH)


# ----------------------------------------------------------------------------
# In-kernel helpers (traced inside Pallas kernel bodies)
# ----------------------------------------------------------------------------
def _ln(x, g, b, eps=LN_EPS):
    """LayerNorm over the last dim. x: (rows, D) f32, g/b: (1, D) f32."""
    mean = jnp.mean(x, axis=-1, keepdims=True)
    var = jnp.mean(jnp.square(x - mean), axis=-1, keepdims=True)
    return (x - mean) * jax.lax.rsqrt(var + eps) * g + b


def _gelu(x):
    """Exact (erf) GELU, matches HF 'gelu'."""
    return 0.5 * x * (1.0 + jax.lax.erf(x * (1.0 / math.sqrt(2.0))))


def _full_spec(shape):
    """Whole-array block with a constant index map (weights / biases)."""
    zeros = (0,) * len(shape)
    return pl.BlockSpec(shape, lambda b, _z=zeros: _z)


# ----------------------------------------------------------------------------
# Kernel 1: single-block matmul + bias (patch embedding projection)
# ----------------------------------------------------------------------------
def _matmul_bias_kernel(x_ref, w_ref, b_ref, o_ref, *, activation):
    y = jnp.dot(x_ref[...].astype(jnp.bfloat16), w_ref[...],
                preferred_element_type=jnp.float32) + b_ref[...].astype(jnp.float32)
    if activation == "gelu":
        y = _gelu(y)
    o_ref[...] = y.astype(o_ref.dtype)


def matmul_bias(x, w, b, activation=None):
    """y = activation(x @ w + b); whole problem in one VMEM block (tiny M/K/N)."""
    M, _ = x.shape
    N = w.shape[1]
    return pl.pallas_call(
        functools.partial(_matmul_bias_kernel, activation=activation),
        out_shape=jax.ShapeDtypeStruct((M, N), jnp.float32),
    )(x, w, b)


# ----------------------------------------------------------------------------
# Kernel 2: fully fused transformer encoder layer
#   grid=(B,) "parallel"; each grid step handles one batch element:
#   LN1 -> QKV -> batched-head attention -> out proj + residual
#   -> LN2 -> MLP1 (GELU) -> MLP2 + residual
# ----------------------------------------------------------------------------
def _encoder_layer_kernel(x_ref, ln1_g, ln1_b, qkv_w, qkv_b, out_w, out_b,
                          ln2_g, ln2_b, mlp1_w, mlp1_b, mlp2_w, mlp2_b,
                          o_ref, *, scale):
    x = x_ref[0].astype(jnp.float32)                                   # (S, D)

    # --- LN1 + fused QKV projection (bf16 MXU, f32 accumulation) ---
    xl = _ln(x, ln1_g[...], ln1_b[...])
    qkv = jnp.dot(xl.astype(jnp.bfloat16), qkv_w[...],
                  preferred_element_type=jnp.float32) + qkv_b[...]     # (S, 3D)

    # --- multi-head attention: all heads batched in one einsum ---
    q = jnp.stack([qkv[:, h * DH:(h + 1) * DH] for h in range(HEADS)], axis=0)
    k = jnp.stack([qkv[:, D + h * DH:D + (h + 1) * DH] for h in range(HEADS)], axis=0)
    v = jnp.stack([qkv[:, 2 * D + h * DH:2 * D + (h + 1) * DH] for h in range(HEADS)],
                  axis=0)                                              # (H, S, DH)
    s = jnp.einsum('hqd,hkd->hqk', q.astype(jnp.bfloat16), k.astype(jnp.bfloat16),
                   preferred_element_type=jnp.float32) * scale         # (H, S, S)
    m = jnp.max(s, axis=-1, keepdims=True)
    p = jnp.exp(s - m)
    p = p * pl.reciprocal(jnp.sum(p, axis=-1, keepdims=True), approx=True)
    ctx = jnp.einsum('hqk,hkd->hqd', p.astype(jnp.bfloat16), v.astype(jnp.bfloat16),
                     preferred_element_type=jnp.float32)               # (H, S, DH)
    ctx = jnp.concatenate([ctx[h] for h in range(HEADS)], axis=-1)     # (S, D)

    # --- attention output projection + residual 1 ---
    x = x + jnp.dot(ctx.astype(jnp.bfloat16), out_w[...],
                    preferred_element_type=jnp.float32) + out_b[...]

    # --- LN2 + MLP (GELU) + residual 2 ---
    xl2 = _ln(x, ln2_g[...], ln2_b[...])
    h1 = jnp.dot(xl2.astype(jnp.bfloat16), mlp1_w[...],
                 preferred_element_type=jnp.float32) + mlp1_b[...]
    h1 = _gelu(h1)
    x = x + jnp.dot(h1.astype(jnp.bfloat16), mlp2_w[...],
                    preferred_element_type=jnp.float32) + mlp2_b[...]

    o_ref[0] = x.astype(o_ref.dtype)


def encoder_layer(x, lp):
    """x: (B, S, D) f32 -> (B, S, D) f32; one pallas_call for the whole layer."""
    batch, s, d = x.shape
    xspec = pl.BlockSpec((1, s, d), lambda b: (b, 0, 0))
    args = [x,
            lp["ln1_g"], lp["ln1_b"], lp["qkv_w"], lp["qkv_b"],
            lp["out_w"], lp["out_b"], lp["ln2_g"], lp["ln2_b"],
            lp["mlp1_w"], lp["mlp1_b"], lp["mlp2_w"], lp["mlp2_b"]]
    in_specs = [xspec] + [_full_spec(a.shape) for a in args[1:]]
    return pl.pallas_call(
        functools.partial(_encoder_layer_kernel, scale=ATTN_SCALE),
        out_shape=jax.ShapeDtypeStruct(x.shape, x.dtype),
        grid_spec=pltpu.PrefetchScalarGridSpec(
            num_scalar_prefetch=0, grid=(batch,),
            in_specs=in_specs, out_specs=xspec),
        compiler_params=pltpu.CompilerParams(
            dimension_semantics=("parallel",)),
    )(*args)


# ----------------------------------------------------------------------------
# Kernel 3: fused classification head (final LN -> mean-pool -> Linear)
# ----------------------------------------------------------------------------
def _head_kernel(x_ref, g_ref, b_ref, w_ref, cb_ref, o_ref):
    x = x_ref[...].astype(jnp.float32)                                 # (B, S, D)
    mean = jnp.mean(x, axis=-1, keepdims=True)
    var = jnp.mean(jnp.square(x - mean), axis=-1, keepdims=True)
    xn = (x - mean) * jax.lax.rsqrt(var + LN_EPS) * g_ref[...] + b_ref[...]
    emb = jnp.mean(xn, axis=1)                                         # (B, D)
    logits = jnp.dot(emb.astype(jnp.bfloat16), w_ref[...],
                     preferred_element_type=jnp.float32) + cb_ref[...]
    o_ref[...] = logits.astype(o_ref.dtype)


def classification_head(x, params):
    """x: (B, S, D) -> logits (B, NB_CLASSES). Classifier weight pre-padded to 128."""
    logits_p = pl.pallas_call(
        _head_kernel,
        out_shape=jax.ShapeDtypeStruct((x.shape[0], NC_PAD), jnp.float32),
    )(x, params["final_ln_g"], params["final_ln_b"],
      params["cls_w"], params["cls_b"])
    return logits_p[:, :NB_CLASSES]


# ----------------------------------------------------------------------------
# Parameters (deterministic synthetic init — shapes follow the AST/ViT layout).
# Matmul weights stored in bf16 (MXU operands), biases / LN params in f32.
# ----------------------------------------------------------------------------
def init_params(key):
    def nrm(k, shape, scale=0.02):
        return (scale * jax.random.normal(k, shape)).astype(jnp.float32)

    keys = iter(jax.random.split(key, 64))

    cls_w = nrm(next(keys), (D, NB_CLASSES))
    cls_w = jnp.pad(cls_w, ((0, 0), (0, NC_PAD - NB_CLASSES))).astype(jnp.bfloat16)

    p = {
        "mel_proj": nrm(next(keys), (WIN, MEL), 0.1),          # synthetic "processor"
        "patch_w": nrm(next(keys), (PATCH * PATCH, D)).astype(jnp.bfloat16),
        "patch_b": jnp.zeros((1, D), jnp.float32),
        "cls_tok": nrm(next(keys), (1, 1, D)),
        "dist_tok": nrm(next(keys), (1, 1, D)),
        "pos_emb": nrm(next(keys), (1, SEQ, D)),
        "final_ln_g": jnp.ones((1, D), jnp.float32),
        "final_ln_b": jnp.zeros((1, D), jnp.float32),
        "cls_w": cls_w,                                        # (D, NC_PAD) bf16
        "cls_b": jnp.zeros((1, NC_PAD), jnp.float32),
        "layers": [],
    }
    for _ in range(LAYERS):
        lk = iter(jax.random.split(next(keys), 16))
        p["layers"].append({
            "ln1_g": jnp.ones((1, D), jnp.float32), "ln1_b": jnp.zeros((1, D), jnp.float32),
            "qkv_w": nrm(next(lk), (D, 3 * D)).astype(jnp.bfloat16),
            "qkv_b": jnp.zeros((1, 3 * D), jnp.float32),
            "out_w": nrm(next(lk), (D, D)).astype(jnp.bfloat16),
            "out_b": jnp.zeros((1, D), jnp.float32),
            "ln2_g": jnp.ones((1, D), jnp.float32), "ln2_b": jnp.zeros((1, D), jnp.float32),
            "mlp1_w": nrm(next(lk), (D, MLP)).astype(jnp.bfloat16),
            "mlp1_b": jnp.zeros((1, MLP), jnp.float32),
            "mlp2_w": nrm(next(lk), (MLP, D)).astype(jnp.bfloat16),
            "mlp2_b": jnp.zeros((1, D), jnp.float32),
        })
    return p


# ----------------------------------------------------------------------------
# Forward pass (glue in plain JAX, compute in Pallas kernels)
# ----------------------------------------------------------------------------
def fake_processor(audio, mel_proj):
    # TODO(synk): the real HF AutoProcessor computes a Kaldi log-mel filterbank on CPU;
    # this is a deterministic stand-in (framing + fixed projection + log + normalize).
    idx = jnp.arange(T_FRAMES)[:, None] * HOP + jnp.arange(WIN)[None, :]
    frames = audio[:, idx]                          # (B, T, WIN)
    spec = jnp.log1p(jnp.abs(frames @ mel_proj))    # (B, T, MEL)
    spec = (spec - jnp.mean(spec)) / (2.0 * jnp.std(spec) + 1e-6)
    return spec.astype(jnp.float32)


def im2col_patches(spec):
    # spec: (B, T, MEL) -> conv input view (B, MEL, T), extract 16x16 patches, stride 10.
    # TODO(synk): at real AST scale (1212 patches) replace this Python slice loop with
    # lax.conv_general_dilated or a scalar-prefetch gather BlockSpec.
    x = jnp.transpose(spec, (0, 2, 1))              # (B, MEL, T)
    cols = []
    for fi in range(F_DIM):
        for ti in range(T_DIM):
            patch = x[:, fi * STRIDE:fi * STRIDE + PATCH,
                         ti * STRIDE:ti * STRIDE + PATCH]
            cols.append(patch.reshape(spec.shape[0], PATCH * PATCH))
    return jnp.stack(cols, axis=1)                  # (B, NUM_PATCHES, PATCH*PATCH)


def ast_classification_forward(audio, params):
    """Equivalent of ASTClassification.forward: raw audio -> class logits."""
    batch = audio.shape[0]
    spec = fake_processor(audio, params["mel_proj"])                   # (B, T, MEL)

    # Patch embedding (Conv2d -> im2col + single-block Pallas matmul).
    cols = im2col_patches(spec)                                        # (B, P, 256)
    patch_emb = matmul_bias(cols.reshape(batch * NUM_PATCHES, PATCH * PATCH),
                            params["patch_w"], params["patch_b"])
    patch_emb = patch_emb.reshape(batch, NUM_PATCHES, D)

    # Prepend [CLS]/[DIST] tokens, add positional embeddings.
    cls = jnp.broadcast_to(params["cls_tok"], (batch, 1, D))
    dst = jnp.broadcast_to(params["dist_tok"], (batch, 1, D))
    x = jnp.concatenate([cls, dst, patch_emb], axis=1) + params["pos_emb"]  # (B, S, D)

    # Transformer encoder: one fused Pallas kernel per layer.
    # TODO(synk): at real AST scale (S~1214) the in-kernel attention should become a
    # tiled flash-attention with online softmax instead of full S x S scores.
    for lp in params["layers"]:
        x = encoder_layer(x, lp)

    # Final LayerNorm -> mean-pool -> classifier, fused.
    # TODO(synk): ClassificationModule definition is not provided; approximated as
    # mean-pool over the sequence + Linear(embedding_dim -> nb_classes).
    return classification_head(x, params)


# ----------------------------------------------------------------------------
if __name__ == "__main__":
    key = jax.random.PRNGKey(0)
    pkey, xkey = jax.random.split(key)
    params = init_params(pkey)
    audio = jax.random.normal(xkey, (B, NUM_SAMPLES), dtype=jnp.float32)

    logits = jax.jit(ast_classification_forward)(audio, params)
    logits = jax.block_until_ready(logits)
    assert logits.shape == (B, NB_CLASSES) and logits.dtype == jnp.float32
    assert bool(jnp.all(jnp.isfinite(logits)))
    print("KERNEL_OK")
</pallas_src>

<mosaic_0001>
module attributes {stable_mosaic.version = 11 : i64} {
  func.func @_matmul_bias_kernel(%arg0: memref<20x256xf32, #tpu.memory_space<vmem>>, %arg1: memref<256x256xbf16, #tpu.memory_space<vmem>>, %arg2: memref<1x256xf32, #tpu.memory_space<vmem>>, %arg3: memref<20x256xf32, #tpu.memory_space<vmem>>) attributes {dimension_semantics = [], scalar_prefetch = 0 : i64, scratch_operands = 0 : i64, tpu.core_type = #tpu.core_type<tc>} {
    %c0 = arith.constant 0 : index
    %c0_0 = arith.constant 0 : index
    %0 = vector.load %arg0[%c0, %c0_0] : memref<20x256xf32, #tpu.memory_space<vmem>>, vector<20x256xf32>
    %1 = arith.truncf %0 : vector<20x256xf32> to vector<20x256xbf16>
    %c0_1 = arith.constant 0 : index
    %c0_2 = arith.constant 0 : index
    %2 = vector.load %arg1[%c0_1, %c0_2] : memref<256x256xbf16, #tpu.memory_space<vmem>>, vector<256x256xbf16>
    %cst = arith.constant dense<0.000000e+00> : vector<20x256xf32>
    %3 = tpu.matmul %1, %2, %cst {dimension_numbers = #tpu.dot_dimension_numbers<[1], [0], [0], [1], [0, 0, 1, 1], [], []>} : vector<20x256xbf16>, vector<256x256xbf16>, vector<20x256xf32> -> vector<20x256xf32>
    %c0_3 = arith.constant 0 : index
    %c0_4 = arith.constant 0 : index
    %4 = vector.load %arg2[%c0_3, %c0_4] : memref<1x256xf32, #tpu.memory_space<vmem>>, vector<1x256xf32>
    %5 = vector.broadcast %4 : vector<1x256xf32> to vector<20x256xf32>
    %6 = arith.addf %3, %5 : vector<20x256xf32>
    %c0_5 = arith.constant 0 : index
    %c0_6 = arith.constant 0 : index
    %7 = vector.load %arg3[%c0_5, %c0_6] : memref<20x256xf32, #tpu.memory_space<vmem>>, vector<20x256xf32>
    tpu.vector_store %arg3[%c0_5, %c0_6], %6 {strides = array<i32>} : memref<20x256xf32, #tpu.memory_space<vmem>>, vector<20x256xf32>,
    return
  }
}

module attributes {stable_mosaic.version = 11 : i64} {
  func.func @_head_kernel(%arg0: memref<2x12x256xf32, #tpu.memory_space<vmem>>, %arg1: memref<1x256xf32, #tpu.memory_space<vmem>>, %arg2: memref<1x256xf32, #tpu.memory_space<vmem>>, %arg3: memref<256x128xbf16, #tpu.memory_space<vmem>>, %arg4: memref<1x128xf32, #tpu.memory_space<vmem>>, %arg5: memref<2x128xf32, #tpu.memory_space<vmem>>) attributes {dimension_semantics = [], scalar_prefetch = 0 : i64, scratch_operands = 0 : i64, tpu.core_type = #tpu.core_type<tc>} {
    %c0 = arith.constant 0 : index
    %c0_0 = arith.constant 0 : index
    %c0_1 = arith.constant 0 : index
    %0 = vector.load %arg0[%c0, %c0_0, %c0_1] : memref<2x12x256xf32, #tpu.memory_space<vmem>>, vector<2x12x256xf32>
    %cst = arith.constant dense<0.000000e+00> : vector<2x12xf32>
    %1 = vector.multi_reduction <add>, %0, %cst [2] : vector<2x12x256xf32> to vector<2x12xf32>
    %2 = vector.shape_cast %1 : vector<2x12xf32> to vector<2x12x1xf32>
    %cst_2 = arith.constant 2.560000e+02 : f32
    %3 = vector.broadcast %cst_2 : f32 to vector<2x12x1xf32>
    %4 = arith.divf %2, %3 : vector<2x12x1xf32>
    %5 = vector.broadcast %4 : vector<2x12x1xf32> to vector<2x12x256xf32>
    %6 = arith.subf %0, %5 : vector<2x12x256xf32>
    %7 = arith.mulf %6, %6 : vector<2x12x256xf32>
    %cst_3 = arith.constant dense<0.000000e+00> : vector<2x12xf32>
    %8 = vector.multi_reduction <add>, %7, %cst_3 [2] : vector<2x12x256xf32> to vector<2x12xf32>
    %9 = vector.shape_cast %8 : vector<2x12xf32> to vector<2x12x1xf32>
    %cst_4 = arith.constant 2.560000e+02 : f32
    %10 = vector.broadcast %cst_4 : f32 to vector<2x12x1xf32>
    %11 = arith.divf %9, %10 : vector<2x12x1xf32>
    %12 = vector.broadcast %4 : vector<2x12x1xf32> to vector<2x12x256xf32>
    %13 = arith.subf %0, %12 : vector<2x12x256xf32>
    %cst_5 = arith.constant 9.99999996E-13 : f32
    %14 = vector.broadcast %cst_5 : f32 to vector<2x12x1xf32>
    %15 = arith.addf %11, %14 : vector<2x12x1xf32>
    %16 = math.rsqrt %15 : vector<2x12x1xf32>
    %17 = vector.broadcast %16 : vector<2x12x1xf32> to vector<2x12x256xf32>
    %18 = arith.mulf %13, %17 : vector<2x12x256xf32>
    %c0_6 = arith.constant 0 : index
    %c0_7 = arith.constant 0 : index
    %19 = vector.load %arg1[%c0_6, %c0_7] : memref<1x256xf32, #tpu.memory_space<vmem>>, vector<1x256xf32>
    %20 = vector.shape_cast %19 : vector<1x256xf32> to vector<1x1x256xf32>
    %21 = vector.broadcast %20 : vector<1x1x256xf32> to vector<2x12x256xf32>
    %22 = arith.mulf %18, %21 : vector<2x12x256xf32>
    %c0_8 = arith.constant 0 : index
    %c0_9 = arith.constant 0 : index
    %23 = vector.load %arg2[%c0_8, %c0_9] : memref<1x256xf32, #tpu.memory_space<vmem>>, vector<1x256xf32>
    %24 = vector.shape_cast %23 : vector<1x256xf32> to vector<1x1x256xf32>
    %25 = vector.broadcast %24 : vector<1x1x256xf32> to vector<2x12x256xf32>
    %26 = arith.addf %22, %25 : vector<2x12x256xf32>
    %cst_10 = arith.constant dense<0.000000e+00> : vector<2x256xf32>
    %27 = vector.multi_reduction <add>, %26, %cst_10 [1] : vector<2x12x256xf32> to vector<2x256xf32>
    %cst_11 = arith.constant 1.200000e+01 : f32
    %28 = vector.broadcast %cst_11 : f32 to vector<2x256xf32>
    %29 = arith.divf %27, %28 : vector<2x256xf32>
    %30 = arith.truncf %29 : vector<2x256xf32> to vector<2x256xbf16>
    %c0_12 = arith.constant 0 : index
    %c0_13 = arith.constant 0 : index
    %31 = vector.load %arg3[%c0_12, %c0_13] : memref<256x128xbf16, #tpu.memory_space<vmem>>, vector<256x128xbf16>
    %cst_14 = arith.constant dense<0.000000e+00> : vector<2x128xf32>
    %32 = tpu.matmul %30, %31, %cst_14 {dimension_numbers = #tpu.dot_dimension_numbers<[1], [0], [0], [1], [0, 0, 1, 1], [], []>} : vector<2x256xbf16>, vector<256x128xbf16>, vector<2x128xf32> -> vector<2x128xf32>
    %c0_15 = arith.constant 0 : index
    %c0_16 = arith.constant 0 : index
    %33 = vector.load %arg4[%c0_15, %c0_16] : memref<1x128xf32, #tpu.memory_space<vmem>>, vector<1x128xf32>
    %34 = vector.broadcast %33 : vector<1x128xf32> to vector<2x128xf32>
    %35 = arith.addf %32, %34 : vector<2x128xf32>
    %c0_17 = arith.constant 0 : index
    %c0_18 = arith.constant 0 : index
    %36 = vector.load %arg5[%c0_17, %c0_18] : memref<2x128xf32, #tpu.memory_space<vmem>>, vector<2x128xf32>
    tpu.vector_store %arg5[%c0_17, %c0_18], %35 {strides = array<i32>} : memref<2x128xf32, #tpu.memory_space<vmem>>, vector<2x128xf32>,
    return
  }
}

module attributes {stable_mosaic.version = 11 : i64} {
  func.func @_encoder_layer_kernel(%arg0: i32, %arg1: memref<1x12x256xf32, #tpu.memory_space<vmem>>, %arg2: memref<1x256xf32, #tpu.memory_space<vmem>>, %arg3: memref<1x256xf32, #tpu.memory_space<vmem>>, %arg4: memref<256x768xbf16, #tpu.memory_space<vmem>>, %arg5: memref<1x768xf32, #tpu.memory_space<vmem>>, %arg6: memref<256x256xbf16, #tpu.memory_space<vmem>>, %arg7: memref<1x256xf32, #tpu.memory_space<vmem>>, %arg8: memref<1x256xf32, #tpu.memory_space<vmem>>, %arg9: memref<1x256xf32, #tpu.memory_space<vmem>>, %arg10: memref<256x512xbf16, #tpu.memory_space<vmem>>, %arg11: memref<1x512xf32, #tpu.memory_space<vmem>>, %arg12: memref<512x256xbf16, #tpu.memory_space<vmem>>, %arg13: memref<1x256xf32, #tpu.memory_space<vmem>>, %arg14: memref<1x12x256xf32, #tpu.memory_space<vmem>>) attributes {dimension_semantics = [#tpu.dimension_semantics<parallel>], iteration_bounds = array<i64: 2>, scalar_prefetch = 0 : i64, scratch_operands = 0 : i64, tpu.core_type = #tpu.core_type<tc>, window_params = [{transform_indices = @transform_0, window_bounds = array<i64: 1, 12, 256>}, {pipeline_mode = #tpu.pipeline_mode<synchronous>, transform_indices = @transform_1, window_bounds = array<i64: 1, 256>}, {pipeline_mode = #tpu.pipeline_mode<synchronous>, transform_indices = @transform_2, window_bounds = array<i64: 1, 256>}, {pipeline_mode = #tpu.pipeline_mode<synchronous>, transform_indices = @transform_3, window_bounds = array<i64: 256, 768>}, {pipeline_mode = #tpu.pipeline_mode<synchronous>, transform_indices = @transform_4, window_bounds = array<i64: 1, 768>}, {pipeline_mode = #tpu.pipeline_mode<synchronous>, transform_indices = @transform_5, window_bounds = array<i64: 256, 256>}, {pipeline_mode = #tpu.pipeline_mode<synchronous>, transform_indices = @transform_6, window_bounds = array<i64: 1, 256>}, {pipeline_mode = #tpu.pipeline_mode<synchronous>, transform_indices = @transform_7, window_bounds = array<i64: 1, 256>}, {pipeline_mode = #tpu.pipeline_mode<synchronous>, transform_indices = @transform_8, window_bounds = array<i64: 1, 256>}, {pipeline_mode = #tpu.pipeline_mode<synchronous>, transform_indices = @transform_9, window_bounds = array<i64: 256, 512>}, {pipeline_mode = #tpu.pipeline_mode<synchronous>, transform_indices = @transform_10, window_bounds = array<i64: 1, 512>}, {pipeline_mode = #tpu.pipeline_mode<synchronous>, transform_indices = @transform_11, window_bounds = array<i64: 512, 256>}, {pipeline_mode = #tpu.pipeline_mode<synchronous>, transform_indices = @transform_12, window_bounds = array<i64: 1, 256>}, {transform_indices = @transform_13, window_bounds = array<i64: 1, 12, 256>}]} {
    %c0 = arith.constant 0 : index
    %c0_0 = arith.constant 0 : index
    %c0_1 = arith.constant 0 : index
    %0 = vector.load %arg1[%c0, %c0_0, %c0_1] : memref<1x12x256xf32, #tpu.memory_space<vmem>>, vector<1x12x256xf32>
    %1 = vector.shape_cast %0 : vector<1x12x256xf32> to vector<12x256xf32>
    %c0_2 = arith.constant 0 : index
    %c0_3 = arith.constant 0 : index
    %2 = vector.load %arg2[%c0_2, %c0_3] : memref<1x256xf32, #tpu.memory_space<vmem>>, vector<1x256xf32>
    %c0_4 = arith.constant 0 : index
    %c0_5 = arith.constant 0 : index
    %3 = vector.load %arg3[%c0_4, %c0_5] : memref<1x256xf32, #tpu.memory_space<vmem>>, vector<1x256xf32>
    %cst = arith.constant dense<0.000000e+00> : vector<12xf32>
    %4 = vector.multi_reduction <add>, %1, %cst [1] : vector<12x256xf32> to vector<12xf32>
    %5 = vector.shape_cast %4 : vector<12xf32> to vector<12x1xf32>
    %cst_6 = arith.constant 2.560000e+02 : f32
    %6 = vector.broadcast %cst_6 : f32 to vector<12x1xf32>
    %7 = arith.divf %5, %6 : vector<12x1xf32>
    %8 = vector.broadcast %7 : vector<12x1xf32> to vector<12x256xf32>
    %9 = arith.subf %1, %8 : vector<12x256xf32>
    %10 = arith.mulf %9, %9 : vector<12x256xf32>
    %cst_7 = arith.constant dense<0.000000e+00> : vector<12xf32>
    %11 = vector.multi_reduction <add>, %10, %cst_7 [1] : vector<12x256xf32> to vector<12xf32>
    %12 = vector.shape_cast %11 : vector<12xf32> to vector<12x1xf32>
    %cst_8 = arith.constant 2.560000e+02 : f32
    %13 = vector.broadcast %cst_8 : f32 to vector<12x1xf32>
    %14 = arith.divf %12, %13 : vector<12x1xf32>
    %15 = vector.broadcast %7 : vector<12x1xf32> to vector<12x256xf32>
    %16 = arith.subf %1, %15 : vector<12x256xf32>
    %cst_9 = arith.constant 9.99999996E-13 : f32
    %17 = vector.broadcast %cst_9 : f32 to vector<12x1xf32>
    %18 = arith.addf %14, %17 : vector<12x1xf32>
    %19 = math.rsqrt %18 : vector<12x1xf32>
    %20 = vector.broadcast %19 : vector<12x1xf32> to vector<12x256xf32>
    %21 = arith.mulf %16, %20 : vector<12x256xf32>
    %22 = vector.broadcast %2 : vector<1x256xf32> to vector<12x256xf32>
    %23 = arith.mulf %21, %22 : vector<12x256xf32>
    %24 = vector.broadcast %3 : vector<1x256xf32> to vector<12x256xf32>
    %25 = arith.addf %23, %24 : vector<12x256xf32>
    %26 = arith.truncf %25 : vector<12x256xf32> to vector<12x256xbf16>
    %c0_10 = arith.constant 0 : index
    %c0_11 = arith.constant 0 : index
    %27 = vector.load %arg4[%c0_10, %c0_11] : memref<256x768xbf16, #tpu.memory_space<vmem>>, vector<256x768xbf16>
    %cst_12 = arith.constant dense<0.000000e+00> : vector<12x768xf32>
    %28 = tpu.matmul %26, %27, %cst_12 {dimension_numbers = #tpu.dot_dimension_numbers<[1], [0], [0], [1], [0, 0, 1, 1], [], []>} : vector<12x256xbf16>, vector<256x768xbf16>, vector<12x768xf32> -> vector<12x768xf32>
    %c0_13 = arith.constant 0 : index
    %c0_14 = arith.constant 0 : index
    %29 = vector.load %arg5[%c0_13, %c0_14] : memref<1x768xf32, #tpu.memory_space<vmem>>, vector<1x768xf32>
    %30 = vector.broadcast %29 : vector<1x768xf32> to vector<12x768xf32>
    %31 = arith.addf %28, %30 : vector<12x768xf32>
    %32 = vector.extract_strided_slice %31 {offsets = [0, 0], sizes = [12, 64], strides = [1, 1]} : vector<12x768xf32> to vector<12x64xf32>
    %33 = vector.extract_strided_slice %31 {offsets = [0, 64], sizes = [12, 64], strides = [1, 1]} : vector<12x768xf32> to vector<12x64xf32>
    %34 = vector.extract_strided_slice %31 {offsets = [0, 128], sizes = [12, 64], strides = [1, 1]} : vector<12x768xf32> to vector<12x64xf32>
    %35 = vector.extract_strided_slice %31 {offsets = [0, 192], sizes = [12, 64], strides = [1, 1]} : vector<12x768xf32> to vector<12x64xf32>
    %36 = vector.shape_cast %32 : vector<12x64xf32> to vector<1x12x64xf32>
    %37 = vector.shape_cast %33 : vector<12x64xf32> to vector<1x12x64xf32>
    %38 = vector.shape_cast %34 : vector<12x64xf32> to vector<1x12x64xf32>
    %39 = vector.shape_cast %35 : vector<12x64xf32> to vector<1x12x64xf32>
    %40 = tpu.concatenate %36, %37, %38, %39 in 0 : vector<1x12x64xf32>, vector<1x12x64xf32>, vector<1x12x64xf32>, vector<1x12x64xf32> -> vector<4x12x64xf32>
    %41 = vector.extract_strided_slice %31 {offsets = [0, 256], sizes = [12, 64], strides = [1, 1]} : vector<12x768xf32> to vector<12x64xf32>
    %42 = vector.extract_strided_slice %31 {offsets = [0, 320], sizes = [12, 64], strides = [1, 1]} : vector<12x768xf32> to vector<12x64xf32>
    %43 = vector.extract_strided_slice %31 {offsets = [0, 384], sizes = [12, 64], strides = [1, 1]} : vector<12x768xf32> to vector<12x64xf32>
    %44 = vector.extract_strided_slice %31 {offsets = [0, 448], sizes = [12, 64], strides = [1, 1]} : vector<12x768xf32> to vector<12x64xf32>
    %45 = vector.shape_cast %41 : vector<12x64xf32> to vector<1x12x64xf32>
    %46 = vector.shape_cast %42 : vector<12x64xf32> to vector<1x12x64xf32>
    %47 = vector.shape_cast %43 : vector<12x64xf32> to vector<1x12x64xf32>
    %48 = vector.shape_cast %44 : vector<12x64xf32> to vector<1x12x64xf32>
    %49 = tpu.concatenate %45, %46, %47, %48 in 0 : vector<1x12x64xf32>, vector<1x12x64xf32>, vector<1x12x64xf32>, vector<1x12x64xf32> -> vector<4x12x64xf32>
    %50 = vector.extract_strided_slice %31 {offsets = [0, 512], sizes = [12, 64], strides = [1, 1]} : vector<12x768xf32> to vector<12x64xf32>
    %51 = vector.extract_strided_slice %31 {offsets = [0, 576], sizes = [12, 64], strides = [1, 1]} : vector<12x768xf32> to vector<12x64xf32>
    %52 = vector.extract_strided_slice %31 {offsets = [0, 640], sizes = [12, 64], strides = [1, 1]} : vector<12x768xf32> to vector<12x64xf32>
    %53 = vector.extract_strided_slice %31 {offsets = [0, 704], sizes = [12, 64], strides = [1, 1]} : vector<12x768xf32> to vector<12x64xf32>
    %54 = vector.shape_cast %50 : vector<12x64xf32> to vector<1x12x64xf32>
    %55 = vector.shape_cast %51 : vector<12x64xf32> to vector<1x12x64xf32>
    %56 = vector.shape_cast %52 : vector<12x64xf32> to vector<1x12x64xf32>
    %57 = vector.shape_cast %53 : vector<12x64xf32> to vector<1x12x64xf32>
    %58 = tpu.concatenate %54, %55, %56, %57 in 0 : vector<1x12x64xf32>, vector<1x12x64xf32>, vector<1x12x64xf32>, vector<1x12x64xf32> -> vector<4x12x64xf32>
    %59 = arith.truncf %40 : vector<4x12x64xf32> to vector<4x12x64xbf16>
    %60 = arith.truncf %49 : vector<4x12x64xf32> to vector<4x12x64xbf16>
    "tpu.trace_start"() <{level = 10 : i32, message = "hqd,hkd->hqk"}> : () -> ()
    %cst_15 = arith.constant dense<0.000000e+00> : vector<4x12x12xf32>
    %61 = tpu.matmul %59, %60, %cst_15 {dimension_numbers = #tpu.dot_dimension_numbers<[2], [2], [1], [1], [0, 0, 0, 1, 1, 1], [0], [0]>} : vector<4x12x64xbf16>, vector<4x12x64xbf16>, vector<4x12x12xf32> -> vector<4x12x12xf32>
    "tpu.trace_stop"() : () -> ()
    %cst_16 = arith.constant 1.250000e-01 : f32
    %62 = vector.broadcast %cst_16 : f32 to vector<4x12x12xf32>
    %63 = arith.mulf %61, %62 : vector<4x12x12xf32>
    %cst_17 = arith.constant dense<0xFF800000> : vector<4x12xf32>
    %64 = vector.multi_reduction <maximumf>, %63, %cst_17 [2] : vector<4x12x12xf32> to vector<4x12xf32>
    %65 = vector.shape_cast %64 : vector<4x12xf32> to vector<4x12x1xf32>
    %66 = vector.broadcast %65 : vector<4x12x1xf32> to vector<4x12x12xf32>
    %67 = arith.subf %63, %66 : vector<4x12x12xf32>
    %68 = math.exp %67 : vector<4x12x12xf32>
    %cst_18 = arith.constant dense<0.000000e+00> : vector<4x12xf32>
    %69 = vector.multi_reduction <add>, %68, %cst_18 [2] : vector<4x12x12xf32> to vector<4x12xf32>
    %70 = vector.shape_cast %69 : vector<4x12xf32> to vector<4x12x1xf32>
    %71 = tpu.reciprocal %70 {approx = true} : vector<4x12x1xf32> -> vector<4x12x1xf32>
    %72 = vector.broadcast %71 : vector<4x12x1xf32> to vector<4x12x12xf32>
    %73 = arith.mulf %68, %72 : vector<4x12x12xf32>
    %74 = arith.truncf %73 : vector<4x12x12xf32> to vector<4x12x12xbf16>
    %75 = arith.truncf %58 : vector<4x12x64xf32> to vector<4x12x64xbf16>
    "tpu.trace_start"() <{level = 10 : i32, message = "hqk,hkd->hqd"}> : () -> ()
    %cst_19 = arith.constant dense<0.000000e+00> : vector<4x12x64xf32>
    %76 = tpu.matmul %74, %75, %cst_19 {dimension_numbers = #tpu.dot_dimension_numbers<[2], [1], [1], [2], [0, 0, 0, 1, 1, 2], [0], [0]>} : vector<4x12x12xbf16>, vector<4x12x64xbf16>, vector<4x12x64xf32> -> vector<4x12x64xf32>
    "tpu.trace_stop"() : () -> ()
    %77 = vector.extract_strided_slice %76 {offsets = [0, 0, 0], sizes = [1, 12, 64], strides = [1, 1, 1]} : vector<4x12x64xf32> to vector<1x12x64xf32>
    %78 = vector.shape_cast %77 : vector<1x12x64xf32> to vector<12x64xf32>
    %79 = vector.extract_strided_slice %76 {offsets = [1, 0, 0], sizes = [1, 12, 64], strides = [1, 1, 1]} : vector<4x12x64xf32> to vector<1x12x64xf32>
    %80 = vector.shape_cast %79 : vector<1x12x64xf32> to vector<12x64xf32>
    %81 = vector.extract_strided_slice %76 {offsets = [2, 0, 0], sizes = [1, 12, 64], strides = [1, 1, 1]} : vector<4x12x64xf32> to vector<1x12x64xf32>
    %82 = vector.shape_cast %81 : vector<1x12x64xf32> to vector<12x64xf32>
    %83 = vector.extract_strided_slice %76 {offsets = [3, 0, 0], sizes = [1, 12, 64], strides = [1, 1, 1]} : vector<4x12x64xf32> to vector<1x12x64xf32>
    %84 = vector.shape_cast %83 : vector<1x12x64xf32> to vector<12x64xf32>
    %85 = tpu.concatenate %78, %80, %82, %84 in 1 : vector<12x64xf32>, vector<12x64xf32>, vector<12x64xf32>, vector<12x64xf32> -> vector<12x256xf32>
    %86 = arith.truncf %85 : vector<12x256xf32> to vector<12x256xbf16>
    %c0_20 = arith.constant 0 : index
    %c0_21 = arith.constant 0 : index
    %87 = vector.load %arg6[%c0_20, %c0_21] : memref<256x256xbf16, #tpu.memory_space<vmem>>, vector<256x256xbf16>
    %cst_22 = arith.constant dense<0.000000e+00> : vector<12x256xf32>
    %88 = tpu.matmul %86, %87, %cst_22 {dimension_numbers = #tpu.dot_dimension_numbers<[1], [0], [0], [1], [0, 0, 1, 1], [], []>} : vector<12x256xbf16>, vector<256x256xbf16>, vector<12x256xf32> -> vector<12x256xf32>
    %89 = arith.addf %1, %88 : vector<12x256xf32>
    %c0_23 = arith.constant 0 : index
    %c0_24 = arith.constant 0 : index
    %90 = vector.load %arg7[%c0_23, %c0_24] : memref<1x256xf32, #tpu.memory_space<vmem>>, vector<1x256xf32>
    %91 = vector.broadcast %90 : vector<1x256xf32> to vector<12x256xf32>
    %92 = arith.addf %89, %91 : vector<12x256xf32>
    %c0_25 = arith.constant 0 : index
    %c0_26 = arith.constant 0 : index
    %93 = vector.load %arg8[%c0_25, %c0_26] : memref<1x256xf32, #tpu.memory_space<vmem>>, vector<1x256xf32>
    %c0_27 = arith.constant 0 : index
    %c0_28 = arith.constant 0 : index
    %94 = vector.load %arg9[%c0_27, %c0_28] : memref<1x256xf32, #tpu.memory_space<vmem>>, vector<1x256xf32>
    %cst_29 = arith.constant dense<0.000000e+00> : vector<12xf32>
    %95 = vector.multi_reduction <add>, %92, %cst_29 [1] : vector<12x256xf32> to vector<12xf32>
    %96 = vector.shape_cast %95 : vector<12xf32> to vector<12x1xf32>
    %cst_30 = arith.constant 2.560000e+02 : f32
    %97 = vector.broadcast %cst_30 : f32 to vector<12x1xf32>
    %98 = arith.divf %96, %97 : vector<12x1xf32>
    %99 = vector.broadcast %98 : vector<12x1xf32> to vector<12x256xf32>
    %100 = arith.subf %92, %99 : vector<12x256xf32>
    %101 = arith.mulf %100, %100 : vector<12x256xf32>
    %cst_31 = arith.constant dense<0.000000e+00> : vector<12xf32>
    %102 = vector.multi_reduction <add>, %101, %cst_31 [1] : vector<12x256xf32> to vector<12xf32>
    %103 = vector.shape_cast %102 : vector<12xf32> to vector<12x1xf32>
    %cst_32 = arith.constant 2.560000e+02 : f32
    %104 = vector.broadcast %cst_32 : f32 to vector<12x1xf32>
    %105 = arith.divf %103, %104 : vector<12x1xf32>
    %106 = vector.broadcast %98 : vector<12x1xf32> to vector<12x256xf32>
    %107 = arith.subf %92, %106 : vector<12x256xf32>
    %cst_33 = arith.constant 9.99999996E-13 : f32
    %108 = vector.broadcast %cst_33 : f32 to vector<12x1xf32>
    %109 = arith.addf %105, %108 : vector<12x1xf32>
    %110 = math.rsqrt %109 : vector<12x1xf32>
    %111 = vector.broadcast %110 : vector<12x1xf32> to vector<12x256xf32>
    %112 = arith.mulf %107, %111 : vector<12x256xf32>
    %113 = vector.broadcast %93 : vector<1x256xf32> to vector<12x256xf32>
    %114 = arith.mulf %112, %113 : vector<12x256xf32>
    %115 = vector.broadcast %94 : vector<1x256xf32> to vector<12x256xf32>
    %116 = arith.addf %114, %115 : vector<12x256xf32>
    %117 = arith.truncf %116 : vector<12x256xf32> to vector<12x256xbf16>
    %c0_34 = arith.constant 0 : index
    %c0_35 = arith.constant 0 : index
    %118 = vector.load %arg10[%c0_34, %c0_35] : memref<256x512xbf16, #tpu.memory_space<vmem>>, vector<256x512xbf16>
    %cst_36 = arith.constant dense<0.000000e+00> : vector<12x512xf32>
    %119 = tpu.matmul %117, %118, %cst_36 {dimension_numbers = #tpu.dot_dimension_numbers<[1], [0], [0], [1], [0, 0, 1, 1], [], []>} : vector<12x256xbf16>, vector<256x512xbf16>, vector<12x512xf32> -> vector<12x512xf32>
    %c0_37 = arith.constant 0 : index
    %c0_38 = arith.constant 0 : index
    %120 = vector.load %arg11[%c0_37, %c0_38] : memref<1x512xf32, #tpu.memory_space<vmem>>, vector<1x512xf32>
    %121 = vector.broadcast %120 : vector<1x512xf32> to vector<12x512xf32>
    %122 = arith.addf %119, %121 : vector<12x512xf32>
    %cst_39 = arith.constant 5.000000e-01 : f32
    %123 = vector.broadcast %cst_39 : f32 to vector<12x512xf32>
    %124 = arith.mulf %123, %122 : vector<12x512xf32>
    %cst_40 = arith.constant 0.707106769 : f32
    %125 = vector.broadcast %cst_40 : f32 to vector<12x512xf32>
    %126 = arith.mulf %122, %125 : vector<12x512xf32>
    %127 = math.erf %126 : vector<12x512xf32>
    %cst_41 = arith.constant 1.000000e+00 : f32
    %128 = vector.broadcast %cst_41 : f32 to vector<12x512xf32>
    %129 = arith.addf %128, %127 : vector<12x512xf32>
    %130 = arith.mulf %124, %129 : vector<12x512xf32>
    %131 = arith.truncf %130 : vector<12x512xf32> to vector<12x512xbf16>
    %c0_42 = arith.constant 0 : index
    %c0_43 = arith.constant 0 : index
    %132 = vector.load %arg12[%c0_42, %c0_43] : memref<512x256xbf16, #tpu.memory_space<vmem>>, vector<512x256xbf16>
    %cst_44 = arith.constant dense<0.000000e+00> : vector<12x256xf32>
    %133 = tpu.matmul %131, %132, %cst_44 {dimension_numbers = #tpu.dot_dimension_numbers<[1], [0], [0], [1], [0, 0, 1, 1], [], []>} : vector<12x512xbf16>, vector<512x256xbf16>, vector<12x256xf32> -> vector<12x256xf32>
    %134 = arith.addf %92, %133 : vector<12x256xf32>
    %c0_45 = arith.constant 0 : index
    %c0_46 = arith.constant 0 : index
    %135 = vector.load %arg13[%c0_45, %c0_46] : memref<1x256xf32, #tpu.memory_space<vmem>>, vector<1x256xf32>
    %136 = vector.broadcast %135 : vector<1x256xf32> to vector<12x256xf32>
    %137 = arith.addf %134, %136 : vector<12x256xf32>
    %c0_47 = arith.constant 0 : index
    %c0_48 = arith.constant 0 : index
    %c0_49 = arith.constant 0 : index
    %138 = vector.load %arg14[%c0_47, %c0_48, %c0_49] : memref<1x12x256xf32, #tpu.memory_space<vmem>>, vector<1x12x256xf32>
    %139 = vector.shape_cast %138 : vector<1x12x256xf32> to vector<12x256xf32>
    %140 = vector.shape_cast %137 : vector<12x256xf32> to vector<1x12x256xf32>
    tpu.vector_store %arg14[%c0_47, %c0_48, %c0_49], %140 {strides = array<i32>} : memref<1x12x256xf32, #tpu.memory_space<vmem>>, vector<1x12x256xf32>,
    return
  }
  func.func @transform_0(%arg0: i32) -> (i32, i32, i32) {
    %c0_i32 = arith.constant 0 : i32
    %c0_i32_0 = arith.constant 0 : i32
    %c0_i32_1 = arith.constant 0 : i32
    return %arg0, %c0_i32, %c0_i32_0 : i32, i32, i32
  }
  func.func @transform_1(%arg0: i32) -> (i32, i32) {
    %c0_i32 = arith.constant 0 : i32
    %c0_i32_0 = arith.constant 0 : i32
    %c0_i32_1 = arith.constant 0 : i32
    return %c0_i32, %c0_i32_0 : i32, i32
  }
  func.func @transform_2(%arg0: i32) -> (i32, i32) {
    %c0_i32 = arith.constant 0 : i32
    %c0_i32_0 = arith.constant 0 : i32
    %c0_i32_1 = arith.constant 0 : i32
    return %c0_i32, %c0_i32_0 : i32, i32
  }
  func.func @transform_3(%arg0: i32) -> (i32, i32) {
    %c0_i32 = arith.constant 0 : i32
    %c0_i32_0 = arith.constant 0 : i32
    %c0_i32_1 = arith.constant 0 : i32
    return %c0_i32, %c0_i32_0 : i32, i32
  }
  func.func @transform_4(%arg0: i32) -> (i32, i32) {
    %c0_i32 = arith.constant 0 : i32
    %c0_i32_0 = arith.constant 0 : i32
    %c0_i32_1 = arith.constant 0 : i32
    return %c0_i32, %c0_i32_0 : i32, i32
  }
  func.func @transform_5(%arg0: i32) -> (i32, i32) {
    %c0_i32 = arith.constant 0 : i32
    %c0_i32_0 = arith.constant 0 : i32
    %c0_i32_1 = arith.constant 0 : i32
    return %c0_i32, %c0_i32_0 : i32, i32
  }
  func.func @transform_6(%arg0: i32) -> (i32, i32) {
    %c0_i32 = arith.constant 0 : i32
    %c0_i32_0 = arith.constant 0 : i32
    %c0_i32_1 = arith.constant 0 : i32
    return %c0_i32, %c0_i32_0 : i32, i32
  }
  func.func @transform_7(%arg0: i32) -> (i32, i32) {
    %c0_i32 = arith.constant 0 : i32
    %c0_i32_0 = arith.constant 0 : i32
    %c0_i32_1 = arith.constant 0 : i32
    return %c0_i32, %c0_i32_0 : i32, i32
  }
  func.func @transform_8(%arg0: i32) -> (i32, i32) {
    %c0_i32 = arith.constant 0 : i32
    %c0_i32_0 = arith.constant 0 : i32
    %c0_i32_1 = arith.constant 0 : i32
    return %c0_i32, %c0_i32_0 : i32, i32
  }
  func.func @transform_9(%arg0: i32) -> (i32, i32) {
    %c0_i32 = arith.constant 0 : i32
    %c0_i32_0 = arith.constant 0 : i32
    %c0_i32_1 = arith.constant 0 : i32
    return %c0_i32, %c0_i32_0 : i32, i32
  }
  func.func @transform_10(%arg0: i32) -> (i32, i32) {
    %c0_i32 = arith.constant 0 : i32
    %c0_i32_0 = arith.constant 0 : i32
    %c0_i32_1 = arith.constant 0 : i32
    return %c0_i32, %c0_i32_0 : i32, i32
  }
  func.func @transform_11(%arg0: i32) -> (i32, i32) {
    %c0_i32 = arith.constant 0 : i32
    %c0_i32_0 = arith.constant 0 : i32
    %c0_i32_1 = arith.constant 0 : i32
    return %c0_i32, %c0_i32_0 : i32, i32
  }
  func.func @transform_12(%arg0: i32) -> (i32, i32) {
    %c0_i32 = arith.constant 0 : i32
    %c0_i32_0 = arith.constant 0 : i32
    %c0_i32_1 = arith.constant 0 : i32
    return %c0_i32, %c0_i32_0 : i32, i32
  }
  func.func @transform_13(%arg0: i32) -> (i32, i32, i32) {
    %c0_i32 = arith.constant 0 : i32
    %c0_i32_0 = arith.constant 0 : i32
    %c0_i32_1 = arith.constant 0 : i32
    return %arg0, %c0_i32, %c0_i32_0 : i32, i32, i32
  }
}

</mosaic_0001>

<bundles_post_ra>
// kernel: ast_classification_forward.4
= control target key start
LH: loop header
LB: loop body
LE: loop exit
PB: predicated region body
PF: predicated region fallthrough
CT: control target
= control target key end

     0   :  { %v58_v42 = vlaneseq  ;;  %s556_s1 = inlined_call_operand.vmem [shape: bf16[256,256], index: 1, kind: input, shape index: {}]   ;;  %s557_s0 = inlined_call_operand.vmem [shape: f32[20,256], index: 0, kind: input, shape index: {}]   ;;  %s558_s2 = inlined_call_operand.vmem [shape: f32[1,256], index: 2, kind: input, shape index: {}]   ;;  %s559_s3 = inlined_call_operand.vmem [shape: f32[20,256], index: 3, kind: output, shape index: {}]  }
   0x1   :  { %v353_v0 = vld [vmem:[%s556_s1 + $0x74] ss:$8 sps:$4 sm:$0xff]   ;;  %v355_v1 = vld [vmem:[%s556_s1 + $0x70] ss:$8 sps:$4 sm:$0xff]   ;;  %v356_v2 = vld [vmem:[%s556_s1 + $0x64] ss:$8 sps:$4 sm:$0xff]  }
   0x2   :  { %228 = vmatprep.subr.bf16.mxu0 %v353_v0  ;;  %321 = vmatprep.subr.bf16.mxu1 %v353_v0  ;;  %v358_v3 = vld [vmem:[%s556_s1 + $0x60] ss:$8 sps:$4 sm:$0xff]   ;;  %v359_v4 = vld [vmem:[%s556_s1 + $0x54] ss:$8 sps:$4 sm:$0xff]   ;;  %v361_v5 = vld [vmem:[%s556_s1 + $0x50] ss:$8 sps:$4 sm:$0xff]  }
   0x3   :  { %229 = vmatpush1.bf16.msra.mxu0 %v355_v1  ;;  %337 = vmatpush1.bf16.msra.mxu1 %v355_v1  ;;  %v362_v6 = vld [vmem:[%s556_s1 + $0x44] ss:$8 sps:$4 sm:$0xff]   ;;  %v364_v7 = vld [vmem:[%s556_s1 + $0x40] ss:$8 sps:$4 sm:$0xff]   ;;  %v365_v8 = vld [vmem:[%s556_s1 + $0x34] ss:$8 sps:$4 sm:$0xff]  }
   0x4   :  { %230 = vmatprep.subr.bf16.mxu0 %v356_v2  ;;  %322 = vmatprep.subr.bf16.mxu1 %v356_v2  ;;  %v367_v9 = vld [vmem:[%s556_s1 + $0x30] ss:$8 sps:$4 sm:$0xff]   ;;  %v368_v10 = vld [vmem:[%s556_s1 + $0x24] ss:$8 sps:$4 sm:$0xff]   ;;  %v370_v11 = vld [vmem:[%s556_s1 + $0x20] ss:$8 sps:$4 sm:$0xff]  }
   0x5   :  { %v371_v12 = vld [vmem:[%s556_s1 + $0x14] ss:$8 sps:$4 sm:$0xff]   ;;  %v15_v13 = vld [vmem:[%s557_s0 + $0x8] sm:$0xff]  ;;  %v373_v17 = vld [vmem:[%s556_s1 + $0x10] ss:$8 sps:$4 sm:$0xff]   ;;  %v59_v43 = vshrl.u32 %v58_v42, 7 }
   0x6   :  { %v17_v14 = vld [vmem:[%s557_s0 + $0x18] sm:$0xff]  ;;  %v19_v16 = vld [vmem:[%s557_s0 + $0x28] sm:$0xf]  ;;  %v374_v19 = vld [vmem:[%s556_s1 + $0x4] ss:$8 sps:$4 sm:$0xff]  }
   0x7   :  { %231 = vmatpush1.bf16.msra.mxu0 %v358_v3  ;;  %338 = vmatpush1.bf16.msra.mxu1 %v358_v3  ;;  %v21_v15 = vpack.c.bf16 %v17_v14, %v15_v13  ;;  %v23_v18 = vpack.c.bf16 %v19_v16, %v19_v16  ;;  %v376_v20 = vld [vmem:[%s556_s1] ss:$8 sps:$4 sm:$0xff]   ;;  %v377_v21 = vld [vmem:[%s556_s1 + $0xf4] ss:$8 sps:$4 sm:$0xff]   ;;  %v379_v22 = vld [vmem:[%s556_s1 + $0xf0] ss:$8 sps:$4 sm:$0xff]  }
   0x8   :  { %232 = vmatprep.subr.bf16.mxu0 %v359_v4  ;;  %323 = vmatprep.subr.bf16.mxu1 %v359_v4  ;;  %v380_v23 = vld [vmem:[%s556_s1 + $0xe4] ss:$8 sps:$4 sm:$0xff]   ;;  %v382_v24 = vld [vmem:[%s556_s1 + $0xe0] ss:$8 sps:$4 sm:$0xff]   ;;  %v383_v25 = vld [vmem:[%s556_s1 + $0xd4] ss:$8 sps:$4 sm:$0xff]  }
   0x9   :  { %260 = vmatprep.mubr.bf16.mxu0 %v21_v15  ;;  %270 = vmatprep.mubr.bf16.mxu1 %v23_v18  ;;  %v385_v26 = vld [vmem:[%s556_s1 + $0xd0] ss:$8 sps:$4 sm:$0xff]   ;;  %v386_v27 = vld [vmem:[%s556_s1 + $0xc4] ss:$8 sps:$4 sm:$0xff]   ;;  %v388_v28 = vld [vmem:[%s556_s1 + $0xc0] ss:$8 sps:$4 sm:$0xff]  }
   0xa   :  { %v389_v29 = vld [vmem:[%s556_s1 + $0xb4] ss:$8 sps:$4 sm:$0xff]   ;;  %v391_v30 = vld [vmem:[%s556_s1 + $0xb0] ss:$8 sps:$4 sm:$0xff]   ;;  %v392_v31 = vld [vmem:[%s556_s1 + $0xa4] ss:$8 sps:$4 sm:$0xff]  }
   0xb   :  { %233 = vmatpush1.bf16.msra.mxu0 %v361_v5  ;;  %339 = vmatpush1.bf16.msra.mxu1 %v361_v5  ;;  %v394_v32 = vld [vmem:[%s556_s1 + $0xa0] ss:$8 sps:$4 sm:$0xff]   ;;  %v395_v33 = vld [vmem:[%s556_s1 + $0x94] ss:$8 sps:$4 sm:$0xff]   ;;  %v397_v34 = vld [vmem:[%s556_s1 + $0x90] ss:$8 sps:$4 sm:$0xff]  }
   0xc   :  { %234 = vmatprep.subr.bf16.mxu0 %v362_v6  ;;  %324 = vmatprep.subr.bf16.mxu1 %v362_v6  ;;  %v398_v35 = vld [vmem:[%s556_s1 + $0x84] ss:$8 sps:$4 sm:$0xff]   ;;  %v400_v36 = vld [vmem:[%s556_s1 + $0x80] ss:$8 sps:$4 sm:$0xff]   ;;  %v16_v38 = vld [vmem:[%s557_s0 + $0x10] sm:$0xff]  ;;  %v60_v44 = vsub.s32 0, %v59_v43 }
   0xd   :  { %v14_v37 = vld [vmem:[%s557_s0] sm:$0xff]  ;;  %v64_v46 = vsub.s32 1, %v59_v43 }
   0xe   :  { %v18_v39 = vld [vmem:[%s557_s0 + $0x20] sm:$0xf]  ;;  %v20_v40 = vpack.c.bf16 %v16_v38, %v14_v37 }
   0xf   :  { %235 = vmatpush1.bf16.msra.mxu0 %v364_v7  ;;  %340 = vmatpush1.bf16.msra.mxu1 %v364_v7  ;;  %v22_v41 = vpack.c.bf16 %v18_v39, %v18_v39  ;;  %v56_v45 = vld [vmem:[%s558_s2] sm:$0x3] }
  0x10   :  { %236 = vmatprep.subr.bf16.mxu0 %v365_v8  ;;  %325 = vmatprep.subr.bf16.mxu1 %v365_v8  ;;  %v61_v47 = vrot.slane %v56_v45, %v60_v44  ;;  %v65_v48 = vrot.slane %v56_v45, %v64_v46 }
  0x13   :  { %237 = vmatpush1.bf16.msra.mxu0 %v367_v9  ;;  %341 = vmatpush1.bf16.msra.mxu1 %v367_v9 }
  0x14   :  { %238 = vmatprep.subr.bf16.mxu0 %v368_v10  ;;  %326 = vmatprep.subr.bf16.mxu1 %v368_v10 }
  0x17   :  { %239 = vmatpush1.bf16.msra.mxu0 %v370_v11  ;;  %342 = vmatpush1.bf16.msra.mxu1 %v370_v11 }
  0x18   :  { %240 = vmatprep.subr.bf16.mxu0 %v371_v12  ;;  %327 = vmatprep.subr.bf16.mxu1 %v371_v12 }
  0x1b   :  { %241 = vmatpush1.bf16.msra.mxu0 %v373_v17  ;;  %343 = vmatpush1.bf16.msra.mxu1 %v373_v17 }
  0x1c   :  { %242 = vmatprep.subr.bf16.mxu0 %v374_v19  ;;  %328 = vmatprep.subr.bf16.mxu1 %v374_v19 }
  0x1f   :  { %243 = vmatpush1.bf16.msra.mxu0 %v376_v20  ;;  %344 = vmatpush1.bf16.msra.mxu1 %v376_v20 }
  0x20   :  { %244 = vmatprep.subr.bf16.mxu0 %v377_v21  ;;  %329 = vmatprep.subr.bf16.mxu1 %v377_v21 }
  0x23   :  { %245 = vmatpush2.bf16.msra.mxu0 %v379_v22  ;;  %345 = vmatpush2.bf16.msra.mxu1 %v379_v22 }
  0x24   :  { %246 = vmatprep.subr.bf16.mxu0 %v380_v23  ;;  %330 = vmatprep.subr.bf16.mxu1 %v380_v23 }
  0x27   :  { %247 = vmatpush2.bf16.msra.mxu0 %v382_v24  ;;  %346 = vmatpush2.bf16.msra.mxu1 %v382_v24 }
  0x28   :  { %248 = vmatprep.subr.bf16.mxu0 %v383_v25  ;;  %331 = vmatprep.subr.bf16.mxu1 %v383_v25 }
  0x2b   :  { %249 = vmatpush2.bf16.msra.mxu0 %v385_v26  ;;  %347 = vmatpush2.bf16.msra.mxu1 %v385_v26 }
  0x2c   :  { %250 = vmatprep.subr.bf16.mxu0 %v386_v27  ;;  %332 = vmatprep.subr.bf16.mxu1 %v386_v27 }
  0x2f   :  { %251 = vmatpush2.bf16.msra.mxu0 %v388_v28  ;;  %348 = vmatpush2.bf16.msra.mxu1 %v388_v28 }
  0x30   :  { %252 = vmatprep.subr.bf16.mxu0 %v389_v29  ;;  %333 = vmatprep.subr.bf16.mxu1 %v389_v29 }
  0x33   :  { %253 = vmatpush2.bf16.msra.mxu0 %v391_v30  ;;  %349 = vmatpush2.bf16.msra.mxu1 %v391_v30 }
  0x34   :  { %254 = vmatprep.subr.bf16.mxu0 %v392_v31  ;;  %334 = vmatprep.subr.bf16.mxu1 %v392_v31 }
  0x37   :  { %255 = vmatpush2.bf16.msra.mxu0 %v394_v32  ;;  %350 = vmatpush2.bf16.msra.mxu1 %v394_v32 }
  0x38   :  { %256 = vmatprep.subr.bf16.mxu0 %v395_v33  ;;  %335 = vmatprep.subr.bf16.mxu1 %v395_v33 }
  0x3b   :  { %257 = vmatpush2.bf16.msra.mxu0 %v397_v34  ;;  %351 = vmatpush2.bf16.msra.mxu1 %v397_v34 }
  0x3c   :  { %258 = vmatprep.subr.bf16.mxu0 %v398_v35  ;;  %336 = vmatprep.subr.bf16.mxu1 %v398_v35 }
  0x3f   :  { %259 = vmatpush2.bf16.msra.mxu0 %v400_v36  ;;  %352 = vmatpush2.bf16.msra.mxu1 %v400_v36 }
  0x42   :  { %261 = vmatmul.mubr.bf16.vlgmr.msra.gmra.mxu0 %v20_v40  ;;  %271 = vmatmul.mubr.bf16.vlgmr.msra.gmra.mxu1 %v22_v41 }
 0x102   :  { %v262_v49 = vpop.f32.mrf.mxu0  ;;  %v272_v50 = vpop.f32.mrf.mxu1 }
 0x103   :  { %v263_v51 = vadd.f32 %v262_v49, %v61_v47  ;;  %v273_v52 = vadd.f32 %v272_v50, %v61_v47 }
 0x104   :  { %v264_v53 = vpop.f32.mrf.mxu0  ;;  %v274_v54 = vpop.f32.mrf.mxu1 }
 0x105   :  { %279 = vst [vmem:[%s559_s3] sm:$0xff] %v263_v51  ;;  %283 = vst [vmem:[%s559_s3 + $0x20] sm:$0xf] %v273_v52  ;;  %v265_v55 = vadd.f32 %v264_v53, %v65_v48  ;;  %v275_v56 = vadd.f32 %v274_v54, %v65_v48 }
 0x106   :  { %v266_v57 = vpop.f32.mrf.mxu0  ;;  %v276_v58 = vpop.f32.mrf.mxu1 }
 0x107   :  { %280 = vst [vmem:[%s559_s3 + $0x8] sm:$0xff] %v265_v55  ;;  %284 = vst [vmem:[%s559_s3 + $0x28] sm:$0xf] %v275_v56  ;;  %v267_v59 = vadd.f32 %v266_v57, %v61_v47 }
 0x108   :  { %v268_v60 = vpop.f32.mrf.mxu0  ;;  %v277_v61 = vpop.f32.mrf.mxu1 }
 0x109   :  { %281 = vst [vmem:[%s559_s3 + $0x10] sm:$0xff] %v267_v59  ;;  %v269_v62 = vadd.f32 %v268_v60, %v65_v48 }
 0x10b   :  { %282 = vst [vmem:[%s559_s3 + $0x18] sm:$0xff] %v269_v62 }

// kernel: ast_classification_forward.7
= control target key start
LH: loop header
LB: loop body
LE: loop exit
PB: predicated region body
PF: predicated region fallthrough
CT: control target
= control target key end

     0   :  { %vm33_vm0 = vcmask 1043456   ;;  %s643_s0 = inlined_call_operand.vmem [shape: f32[2,12,256], index: 0, kind: input, shape index: {}]   ;;  %s644_s1 = inlined_call_operand.vmem [shape: f32[1,256], index: 1, kind: input, shape index: {}]   ;;  %s645_s2 = inlined_call_operand.vmem [shape: f32[1,256], index: 2, kind: input, shape index: {}]   ;;  %s646_s3 = inlined_call_operand.vmem [shape: bf16[256,128], index: 3, kind: input, shape index: {}]   ;;  %s647_s4 = inlined_call_operand.vmem [shape: f32[1,128], index: 4, kind: input, shape index: {}]   ;;  %s648_s5 = inlined_call_operand.hbm [shape: f32[2,128], index: 5, kind: output, shape index: {}]  }
   0x1   :  { %v24_v0 = vld [vmem:[%s643_s0 + $0x10] sm:$0xf]  ;;  %v25_v1 = vld [vmem:[%s643_s0 + $0x18] sm:$0xf]  ;;  %v22_v2 = vld [vmem:[%s643_s0] sm:$0xff] }
   0x2   :  { %v34_v3 = vsel %vm33_vm0, %v24_v0, 0.0  ;;  %v35_v4 = vsel %vm33_vm0, %v25_v1, 0.0  ;;  %v28_v5 = vld [vmem:[%s643_s0 + $0x30] sm:$0xf]  ;;  %v29_v6 = vld [vmem:[%s643_s0 + $0x38] sm:$0xf] }
   0x3   :  { %v36_v7 = vadd.f32 %v35_v4, %v34_v3  ;;  %v42_v8 = vsel %vm33_vm0, %v28_v5, 0.0  ;;  %v43_v9 = vsel %vm33_vm0, %v29_v6, 0.0  ;;  %v23_v10 = vld [vmem:[%s643_s0 + $0x8] sm:$0xff]  ;;  %v26_v11 = vld [vmem:[%s643_s0 + $0x20] sm:$0xff] }
   0x4   :  { %v27_v12 = vld [vmem:[%s643_s0 + $0x28] sm:$0xff]  ;;  %v30_v13 = vadd.f32 %v23_v10, %v22_v2  ;;  %v44_v14 = vadd.f32 %v43_v9, %v42_v8 }
   0x5   :  { %37 = vadd.xlane.f32.xlu0 %v36_v7  ;;  %v39_v15 = vadd.f32 %v27_v12, %v26_v11 }
   0x6   :  { %31 = vadd.xlane.f32.xlu1 %v30_v13 }
   0x9   :  { %45 = vadd.xlane.f32.xlu0 %v44_v14 }
   0xa   :  { %40 = vadd.xlane.f32.xlu1 %v39_v15 }
   0xb   :  { %10 = vsyncpa [#allocation3], 0  ;;  %v430_v48 = vld [vmem:[%s646_s3 + $0x78] sm:$0xff]   ;;  %v432_v50 = vld [vmem:[%s646_s3 + $0x70] sm:$0xff]   ;;  %vm232_vm1 = vcmask 1041409   ;;  %s476_s17 = smov [#allocation2]  }
   0xc   :  { %v431_v49 = vld [vmem:[%s646_s3 + $0x38] sm:$0xff]   ;;  %407 = vmatprep.subr.bf16.mxu0 %v430_v48  ;;  %v433_v51 = vld [vmem:[%s646_s3 + $0x30] sm:$0xff]   ;;  %v434_v52 = vld [vmem:[%s646_s3 + $0x68] sm:$0xff]   ;;  %s382_s18 = sshll.u32 %s476_s17, 4  ;;  %s383_s18 = int_to_ptr.vmem [resolvable:$true] %s382_s18 }
   0xd   :  { %408 = vmatpush3.bf16.msra.mxu0 %v431_v49  ;;  %v435_v53 = vld [vmem:[%s646_s3 + $0x28] sm:$0xff]   ;;  %v436_v54 = vld [vmem:[%s646_s3 + $0x60] sm:$0xff]   ;;  %v438_v56 = vld [vmem:[%s646_s3 + $0x58] sm:$0xff]   ;;  %s454_s19 = scalar_lea.vmem %s383_s18, 32  ;;  %p459_p1 = scmp.lt.s32.totalorder %s383_s18, %s383_s18 }
   0xe   :  { %409 = vmatprep.subr.bf16.mxu0 %v432_v50  ;;  %v437_v55 = vld [vmem:[%s646_s3 + $0x20] sm:$0xff]   ;;  %v439_v57 = vld [vmem:[%s646_s3 + $0x18] sm:$0xff]   ;;  %v440_v58 = vld [vmem:[%s646_s3 + $0x50] sm:$0xff]   ;;  %p455_p0 = scmp.ne.s32.totalorder %s383_s18, %s454_s19  ;;  %p460_p2 = scmp.lt.s32.totalorder %s454_s19, %s454_s19 }
   0xf   :  { %v441_v59 = vld [vmem:[%s646_s3 + $0x10] sm:$0xff]   ;;  %v442_v60 = vld [vmem:[%s646_s3 + $0x48] sm:$0xff]   ;;  %v444_v62 = vld [vmem:[%s646_s3 + $0x40] sm:$0xff]  }
  0x10   :  { %v443_v61 = vld [vmem:[%s646_s3 + $0x8] sm:$0xff]   ;;  %v445_v63 = vld [vmem:[%s646_s3] sm:$0xff]   ;;  %p461_p3 = por %p460_p2, %p459_p1 }
  0x11   :  { %410 = vmatpush3.bf16.msra.mxu0 %v433_v51 }
  0x12   :  { %411 = vmatprep.subr.bf16.mxu0 %v434_v52  ;;  %p462_p4 = pnand %p461_p3, %p455_p0 }
  0x15   :  { %412 = vmatpush3.bf16.msra.mxu0 %v435_v53 }
  0x16   :  { %413 = vmatprep.subr.bf16.mxu0 %v436_v54 }
  0x19   :  { %414 = vmatpush3.bf16.msra.mxu0 %v437_v55 }
  0x1a   :  { %415 = vmatprep.subr.bf16.mxu0 %v438_v56 }
  0x1d   :  { %416 = vmatpush3.bf16.msra.mxu0 %v439_v57 }
  0x1e   :  { %417 = vmatprep.subr.bf16.mxu0 %v440_v58 }
  0x21   :  { %418 = vmatpush3.bf16.msra.mxu0 %v441_v59 }
  0x22   :  { %419 = vmatprep.subr.bf16.mxu0 %v442_v60 }
  0x25   :  { %420 = vmatpush3.bf16.msra.mxu0 %v443_v61 }
  0x26   :  { %421 = vmatprep.subr.bf16.mxu0 %v444_v62 }
  0x29   :  { %422 = vmatpush3.bf16.msra.mxu0 %v445_v63 }
  0x8e   :  { %v38_v16 = vpop.xlane.xlu0 %37 }
  0x8f   :  { %v49_v17 = vmul.f32 0.00390625, %v38_v16  ;;  %v32_v18 = vpop.xlane.xlu1 %31  ;;  %v104_v16 = vld [vmem:[%s644_s1] sm:$0x3] }
  0x90   :  { %v48_v19 = vmul.f32 0.00390625, %v32_v18 }
  0x91   :  { %v535_v20 = vsub.f32 %v24_v0, %v49_v17  ;;  %v537_v21 = vsub.f32 %v25_v1, %v49_v17 }
  0x92   :  { %v46_v22 = vpop.xlane.xlu0 %45  ;;  %v539_v23 = vsub.f32 %v22_v2, %v48_v19  ;;  %v541_v24 = vsub.f32 %v23_v10, %v48_v19  ;;  %v124_v19 = vld [vmem:[%s645_s2] sm:$0x3] }
  0x93   :  { %v51_v25 = vmul.f32 0.00390625, %v46_v22  ;;  %v41_v26 = vpop.xlane.xlu1 %40  ;;  %v62_v27 = vmul.f32 %v535_v20, %v535_v20  ;;  %v63_v28 = vmul.f32 %v537_v21, %v537_v21 }
  0x94   :  { %v50_v29 = vmul.f32 0.00390625, %v41_v26  ;;  %v60_v30 = vmul.f32 %v539_v23, %v539_v23  ;;  %v61_v31 = vmul.f32 %v541_v24, %v541_v24 }
  0x95   :  { %v551_v32 = vsub.f32 %v28_v5, %v51_v25  ;;  %v553_v33 = vsub.f32 %v29_v6, %v51_v25  ;;  %v71_v34 = vsel %vm33_vm0, %v62_v27, 0.0  ;;  %v72_v35 = vsel %vm33_vm0, %v63_v28, 0.0 }
  0x96   :  { %v557_v36 = vsub.f32 %v26_v11, %v50_v29  ;;  %v559_v37 = vsub.f32 %v27_v12, %v50_v29  ;;  %v73_v38 = vadd.f32 %v72_v35, %v71_v34  ;;  %v68_v41 = vadd.f32 %v61_v31, %v60_v30 }
  0x97   :  { %v66_v39 = vmul.f32 %v551_v32, %v551_v32  ;;  %v67_v40 = vmul.f32 %v553_v33, %v553_v33  ;;  %v106_v5 = vlaneseq }
  0x98   :  { %74 = vadd.xlane.f32.xlu0 %v73_v38  ;;  %v64_v42 = vmul.f32 %v557_v36, %v557_v36  ;;  %v65_v43 = vmul.f32 %v559_v37, %v559_v37 }
  0x99   :  { %v79_v44 = vsel %vm33_vm0, %v66_v39, 0.0  ;;  %v80_v45 = vsel %vm33_vm0, %v67_v40, 0.0  ;;  %v107_v11 = vshrl.u32 %v106_v5, 7 }
  0x9a   :  { %v81_v46 = vadd.f32 %v80_v45, %v79_v44  ;;  %v76_v47 = vadd.f32 %v65_v43, %v64_v42 }
  0x9b   :  { %v108_v14 = vsub.s32 0, %v107_v11  ;;  %v112_v15 = vsub.s32 1, %v107_v11 }
  0x9c   :  { %82 = vadd.xlane.f32.xlu1 %v81_v46  ;;  %69 = vadd.xlane.f32.xlu0 %v68_v41 }
  0x9d   :  { %v109_v17 = vrot.slane %v104_v16, %v108_v14  ;;  %v113_v18 = vrot.slane %v104_v16, %v112_v15  ;;  %v129_v27 = vrot.slane %v124_v19, %v108_v14  ;;  %v133_v28 = vrot.slane %v124_v19, %v112_v15 }
  0xa0   :  { %77 = vadd.xlane.f32.xlu1 %v76_v47 }
 0x121   :  { %v75_v0 = vpop.xlane.xlu0 %74 }
 0x122   :  { %v85_v1 = vmul.f32 0.00390625, %v75_v0 }
 0x124   :  { %v89_v2 = vadd.f32 1e-12, %v85_v1 }
 0x125   :  { %v70_v3 = vpop.xlane.xlu0 %69  ;;  %v83_v4 = vpop.xlane.xlu1 %82 }
 0x126   :  { %446 = vrsqrt.f32 %v89_v2  ;;  %v84_v6 = vmul.f32 0.00390625, %v70_v3  ;;  %v87_v7 = vmul.f32 0.00390625, %v83_v4 }
 0x128   :  { %v88_v8 = vadd.f32 1e-12, %v84_v6  ;;  %v91_v9 = vadd.f32 1e-12, %v87_v7 }
 0x129   :  { %v78_v10 = vpop.xlane.xlu1 %77 }
 0x12a   :  { %448 = vrsqrt.f32 %v88_v8  ;;  %v86_v12 = vmul.f32 0.00390625, %v78_v10 }
 0x12b   :  { %450 = vrsqrt.f32 %v91_v9 }
 0x12c   :  { %v90_v13 = vadd.f32 1e-12, %v86_v12 }
 0x12e   :  { %452 = vrsqrt.f32 %v90_v13 }
 0x133   :  { %v447_v22 = vpop.eup %446 }
 0x134   :  { %v98_v25 = vmul.f32 %v447_v22, %v535_v20  ;;  %v99_v26 = vmul.f32 %v447_v22, %v537_v21 }
 0x136   :  { %v118_v29 = vmul.f32 %v109_v17, %v98_v25  ;;  %v119_v30 = vmul.f32 %v113_v18, %v99_v26 }
 0x137   :  { %v449_v31 = vpop.eup %448 }
 0x138   :  { %v451_v34 = vpop.eup %450  ;;  %v96_v35 = vmul.f32 %v449_v31, %v539_v23  ;;  %v97_v38 = vmul.f32 %v449_v31, %v541_v24  ;;  %v139_v41 = vadd.f32 %v133_v28, %v119_v30  ;;  %v138_v42 = vadd.f32 %v129_v27, %v118_v29 }
 0x139   :  { %v102_v39 = vmul.f32 %v451_v34, %v551_v32  ;;  %v103_v40 = vmul.f32 %v451_v34, %v553_v33 }
 0x13a   :  { %v116_v43 = vmul.f32 %v109_v17, %v96_v35  ;;  %v117_v20 = vmul.f32 %v113_v18, %v97_v38  ;;  %v152_v24 = vsel %vm33_vm0, %v139_v41, 0.0  ;;  %v144_v32 = vsel %vm33_vm0, %v138_v42, 0.0 }
 0x13b   :  { %v453_v44 = vpop.eup %452  ;;  %v122_v21 = vmul.f32 %v109_v17, %v102_v39  ;;  %v123_v45 = vmul.f32 %v113_v18, %v103_v40 }
 0x13c   :  { %v100_v46 = vmul.f32 %v453_v44, %v557_v36  ;;  %v101_v47 = vmul.f32 %v453_v44, %v559_v37  ;;  %v137_v48 = vadd.f32 %v133_v28, %v117_v20  ;;  %v136_v49 = vadd.f32 %v129_v27, %v116_v43  ;;  %v390_v20 = vld [vmem:[%s647_s4] ss:$0 sm:$0xff] }
 0x13d   :  { %v143_v23 = vadd.f32 %v133_v28, %v123_v45  ;;  %v142_v50 = vadd.f32 %v129_v27, %v122_v21 }
 0x13e   :  { %v120_v33 = vmul.f32 %v109_v17, %v100_v46  ;;  %v121_v51 = vmul.f32 %v113_v18, %v101_v47  ;;  %v153_v52 = vadd.f32 %v152_v24, %v137_v48  ;;  %v145_v53 = vadd.f32 %v144_v32, %v136_v49 }
 0x13f   :  { %v168_v36 = vsel %vm33_vm0, %v143_v23, 0.0  ;;  %v160_v37 = vsel %vm33_vm0, %v142_v50, 0.0 }
 0x140   :  { %v141_v54 = vadd.f32 %v133_v28, %v121_v51  ;;  %v154_v55 = vrot.slane %v153_v52, 4  ;;  %v140_v56 = vadd.f32 %v129_v27, %v120_v33  ;;  %v146_v57 = vrot.slane %v145_v53, 4 }
 0x142   :  { %v155_v58 = vadd.f32 %v154_v55, %v153_v52  ;;  %v169_v59 = vadd.f32 %v168_v36, %v141_v54  ;;  %v147_v60 = vadd.f32 %v146_v57, %v145_v53  ;;  %v161_v61 = vadd.f32 %v160_v37, %v140_v56 }
 0x144   :  { %v156_v62 = vrot.slane %v155_v58, 2  ;;  %v170_v63 = vrot.slane %v169_v59, 4  ;;  %v148_v0 = vrot.slane %v147_v60, 2  ;;  %v162_v1 = vrot.slane %v161_v61, 4 }
 0x146   :  { %v157_v2 = vadd.f32 %v156_v62, %v155_v58  ;;  %v171_v3 = vadd.f32 %v170_v63, %v169_v59  ;;  %v149_v4 = vadd.f32 %v148_v0, %v147_v60  ;;  %v163_v5 = vadd.f32 %v162_v1, %v161_v61 }
 0x148   :  { %v158_v6 = vrot.slane %v157_v2, 1  ;;  %v172_v7 = vrot.slane %v171_v3, 2  ;;  %v150_v8 = vrot.slane %v149_v4, 1  ;;  %v164_v9 = vrot.slane %v163_v5, 2 }
 0x14a   :  { %v159_v10 = vadd.f32 %v158_v6, %v157_v2  ;;  %v173_v11 = vadd.f32 %v172_v7, %v171_v3  ;;  %v151_v12 = vadd.f32 %v150_v8, %v149_v4  ;;  %v165_v13 = vadd.f32 %v164_v9, %v163_v5 }
 0x14c   :  { %v174_v14 = vrot.slane %v173_v11, 1  ;;  %v178_v15 = vmul.f32 0.083333336, %v159_v10  ;;  %v166_v16 = vrot.slane %v165_v13, 1  ;;  %v177_v17 = vmul.f32 0.083333336, %v151_v12 }
 0x14e   :  { %v175_v18 = vadd.f32 %v174_v14, %v173_v11  ;;  %v167_v19 = vadd.f32 %v166_v16, %v165_v13  ;;  %v182_v25 = vpack.c.bf16 %v178_v15, %v178_v15  ;;  %v181_v27 = vpack.c.bf16 %v177_v17, %v177_v17 }
 0x150   :  { %v180_v22 = vmul.f32 0.083333336, %v175_v18  ;;  %v179_v26 = vmul.f32 0.083333336, %v167_v19  ;;  %v229_v30 = vunpack.c.l.b16 %v182_v25  ;;  %v228_v34 = vunpack.c.l.b16 %v181_v27 }
 0x152   :  { %v184_v28 = vpack.c.bf16 %v180_v22, %v180_v22  ;;  %v183_v29 = vpack.c.bf16 %v179_v26, %v179_v26 }
 0x154   :  { %v231_v31 = vunpack.c.l.b16 %v184_v28  ;;  %v230_v35 = vunpack.c.l.b16 %v183_v29 }
 0x156   :  { %v234_v38 = vsel %vm232_vm1, %v231_v31, %v229_v30  ;;  %v233_v39 = vsel %vm232_vm1, %v230_v35, %v228_v34 }
 0x157   :  { %v236_v40 = vpack.c.b16 %v234_v38, %v234_v38  ;;  %v235_v41 = vpack.c.b16 %v233_v39, %v233_v39 }
 0x159   :  { %367 = vmatprep.mubr.bf16.mxu0 %v236_v40 }
 0x15a   :  { %368 = vmatmul.mubr.bf16.vlgmr.msra.gmra.mxu0 %v235_v41 }
 0x21a   :  { %v423_v42 = vpop.f32.mrf.mxu0 }
 0x21c   :  { %v424_v43 = vpop.f32.mrf.mxu0 }
 0x21d   :  { %v425_v44 = vadd.f32 %v424_v43, %v423_v42 }
 0x21e   :  { %v426_v21 = vpop.f32.mrf.mxu0 }
 0x21f   :  { %v370_v45 = vadd.f32 %v425_v44, %v390_v20 }
 0x220   :  { %v427_v46 = vpop.f32.mrf.mxu0 }
 0x221   :  { %375 = vst [vmem:[#allocation2] sm:$0x3] %v370_v45 }
 0x222   :  { %465 = shalt.err (!%p462_p4)
}
 0x223   :  { %385 = dma.vmem_to_hbm [thread:$0]  %s383_s18, 32, %s648_s5, [#allocation3]  }
 0x224   :  { %474 = dma.done.wait [#allocation3], 32  }
 0x225   :  { %475 = vsyncadd [#allocation3], 4294967264 }
 0x226   :  { %389 = vsyncpa [#allocation3], 1 }

// kernel: ast_classification_forward.5
= control target key start
LH: loop header
LB: loop body
LE: loop exit
PB: predicated region body
PF: predicated region fallthrough
CT: control target
= control target key end

     0   :  { %s4144_s25 = smov 0   ;;  %s5195_s0 = inlined_call_operand.vmem [shape: f32[2,12,256], index: 0, kind: input, shape index: {}]   ;;  %s5196_s1 = inlined_call_operand.vmem [shape: f32[1,256], index: 1, kind: input, shape index: {}]   ;;  %s5197_s2 = inlined_call_operand.vmem [shape: f32[1,256], index: 2, kind: input, shape index: {}]   ;;  %s5198_s3 = inlined_call_operand.vmem [shape: bf16[256,768], index: 3, kind: input, shape index: {}]   ;;  %s5199_s4 = inlined_call_operand.vmem [shape: f32[1,768], index: 4, kind: input, shape index: {}]   ;;  %s5200_s5 = inlined_call_operand.vmem [shape: bf16[256,256], index: 5, kind: input, shape index: {}]   ;;  %s5201_s6 = inlined_call_operand.vmem [shape: f32[1,256], index: 6, kind: input, shape index: {}]   ;;  %s5202_s7 = inlined_call_operand.vmem [shape: f32[1,256], index: 7, kind: input, shape index: {}]   ;;  %s5203_s8 = inlined_call_operand.vmem [shape: f32[1,256], index: 8, kind: input, shape index: {}]   ;;  %s5204_s9 = inlined_call_operand.vmem [shape: bf16[256,512], index: 9, kind: input, shape index: {}]   ;;  %s5205_s10 = inlined_call_operand.vmem [shape: f32[1,512], index: 10, kind: input, shape index: {}]   ;;  %s5206_s11 = inlined_call_operand.vmem [shape: bf16[512,256], index: 11, kind: input, shape index: {}]   ;;  %s5207_s12 = inlined_call_operand.vmem [shape: f32[1,256], index: 12, kind: input, shape index: {}]   ;;  %s5208_s13 = inlined_call_operand.vmem [shape: f32[2,12,256], index: 13, kind: output, shape index: {}]  }
   0x1 LB: > { %s3227_s26 = sadd.s32 4294967295, %s4069_s25   ;;  %p3231_p0 = scmp.ge.s32.totalorder %s4069_s25, 1  ;;  %s4069_s25 = sphi %s4144_s25, %s23_s25  }
   0x2   : > { %p387_p1 = scmp.lt.s32.totalorder %s4069_s25, 3 }
   0x4   : > { %p388_p2 = pnand %p3231_p0, %p387_p1 }
   0x5   : > { %p431_p3 = scmp.lt.s32.totalorder (!%p388_p2), %s3227_s26, 1  ;;  %s4073_s17 = smov (!%p388_p2), 64  }
   0x6   : > { %391 = sbr.rel (%p388_p2) target bundleno = 2472 (0x9a8), region = 72 }
   0xb   : > { %s5210_s26 = smov (!%p431_p3, %s3227_s26), 1  ;;  %vm451_vm0 = vcmask 1043456   ;;  %v3619_v8 = vld [vmem:[%s5198_s3 + $0x154] ss:$24 sps:$4 sm:$0xff]   ;;  %v3621_v9 = vld [vmem:[%s5198_s3 + $0x150] ss:$24 sps:$4 sm:$0xff]  }
   0xc   : > { %s3502_s27 = sshll.u32 %s5210_s26, 5  ;;  %v3622_v10 = vld [vmem:[%s5198_s3 + $0x15c] ss:$24 sps:$4 sm:$0xff]   ;;  %v3624_v11 = vld [vmem:[%s5198_s3 + $0x158] ss:$24 sps:$4 sm:$0xff]   ;;  %1126 = vmatprep.subr.bf16.mxu0 %v3619_v8  ;;  %vm4072_vm1 = vmmov 0  }
   0xd   : > { %s4160_s30 = scalar_lea.vmem %s5195_s0, %s3502_s27  ;;  %v3625_v12 = vld [vmem:[%s5198_s3 + $0x124] ss:$24 sps:$4 sm:$0xff]   ;;  %1169 = vmatprep.subr.bf16.mxu1 %v3622_v10  ;;  %1127 = vmatpush1.bf16.msra.mxu0 %v3621_v9  ;;  %v3627_v14 = vld [vmem:[%s5198_s3 + $0x120] ss:$24 sps:$4 sm:$0xff]   ;;  %v3631_v16 = vld [vmem:[%s5198_s3 + $0xf4] ss:$24 sps:$4 sm:$0xff]   ;;  %s440_s23 = scalar_lea.vmem %s5208_s13, %s3502_s27 }
   0xe   : > { %v4163_v0 = vld [vmem:[%s4160_s30 + $0x10] sm:$0xf]  ;;  %v4166_v1 = vld [vmem:[%s4160_s30 + $0x18] sm:$0xf]  ;;  %v4169_v2 = vld [vmem:[%s4160_s30] sm:$0xff]  ;;  %1170 = vmatpush1.bf16.msra.mxu1 %v3624_v11  ;;  %1128 = vmatprep.subr.bf16.mxu0 %v3625_v12  ;;  %vm1311_vm2 = vcmask 523264  }
   0xf   : > { %v452_v3 = vsel %vm451_vm0, %v4163_v0, 0.0  ;;  %v453_v4 = vsel %vm451_vm0, %v4166_v1, 0.0  ;;  %v4176_v5 = vld [vmem:[%s4160_s30 + $0x8] sm:$0xff]  ;;  %v3634_v17 = vld [vmem:[%s5198_s3 + $0xfc] ss:$24 sps:$4 sm:$0xff]   ;;  %vm1609_vm3 = vcmask 1045504  }
  0x10   : > { %v454_v6 = vadd.f32 %v453_v4, %v452_v3  ;;  %v448_v7 = vadd.f32 %v4176_v5, %v4169_v2  ;;  %v3628_v13 = vld [vmem:[%s5198_s3 + $0x12c] ss:$24 sps:$4 sm:$0xff]   ;;  %v3630_v15 = vld [vmem:[%s5198_s3 + $0x128] ss:$24 sps:$4 sm:$0xff]   ;;  %v3636_v19 = vld [vmem:[%s5198_s3 + $0xf8] ss:$24 sps:$4 sm:$0xff]  }
  0x11   : > { %1171 = vmatprep.subr.bf16.mxu1 %v3628_v13  ;;  %1129 = vmatpush1.bf16.msra.mxu0 %v3627_v14  ;;  %v3633_v18 = vld [vmem:[%s5198_s3 + $0xf0] ss:$24 sps:$4 sm:$0xff]   ;;  %v3637_v20 = vld [vmem:[%s5198_s3 + $0xc4] ss:$24 sps:$4 sm:$0xff]   ;;  %v3639_v22 = vld [vmem:[%s5198_s3 + $0xc0] ss:$24 sps:$4 sm:$0xff]  }
  0x12   : > { %455 = vadd.xlane.f32.xlu0 %v454_v6  ;;  %1172 = vmatpush1.bf16.msra.mxu1 %v3630_v15  ;;  %v3640_v21 = vld [vmem:[%s5198_s3 + $0xcc] ss:$24 sps:$4 sm:$0xff]   ;;  %v3642_v23 = vld [vmem:[%s5198_s3 + $0xc8] ss:$24 sps:$4 sm:$0xff]   ;;  %v3646_v25 = vld [vmem:[%s5198_s3 + $0x9c] ss:$24 sps:$4 sm:$0xff]  }
  0x13   : > { %1130 = vmatprep.subr.bf16.mxu0 %v3631_v16  ;;  %1173 = vmatprep.subr.bf16.mxu1 %v3634_v17  ;;  %v3643_v24 = vld [vmem:[%s5198_s3 + $0x94] ss:$24 sps:$4 sm:$0xff]   ;;  %v3645_v26 = vld [vmem:[%s5198_s3 + $0x90] ss:$24 sps:$4 sm:$0xff]   ;;  %v3649_v28 = vld [vmem:[%s5198_s3 + $0x64] ss:$24 sps:$4 sm:$0xff]  }
  0x14   : > { %v3648_v27 = vld [vmem:[%s5198_s3 + $0x98] ss:$24 sps:$4 sm:$0xff]   ;;  %v3652_v29 = vld [vmem:[%s5198_s3 + $0x6c] ss:$24 sps:$4 sm:$0xff]   ;;  %v3654_v31 = vld [vmem:[%s5198_s3 + $0x68] ss:$24 sps:$4 sm:$0xff]  }
  0x15   : > { %1131 = vmatpush1.bf16.msra.mxu0 %v3633_v18  ;;  %v3651_v30 = vld [vmem:[%s5198_s3 + $0x60] ss:$24 sps:$4 sm:$0xff]   ;;  %v3655_v32 = vld [vmem:[%s5198_s3 + $0x34] ss:$24 sps:$4 sm:$0xff]   ;;  %v3657_v34 = vld [vmem:[%s5198_s3 + $0x30] ss:$24 sps:$4 sm:$0xff]  }
  0x16   : > { %449 = vadd.xlane.f32.xlu0 %v448_v7  ;;  %1174 = vmatpush1.bf16.msra.mxu1 %v3636_v19  ;;  %v3658_v33 = vld [vmem:[%s5198_s3 + $0x3c] ss:$24 sps:$4 sm:$0xff]   ;;  %v3660_v35 = vld [vmem:[%s5198_s3 + $0x38] ss:$24 sps:$4 sm:$0xff]   ;;  %v3664_v37 = vld [vmem:[%s5198_s3 + $0xc] ss:$24 sps:$4 sm:$0xff]  }
  0x17   : > { %1132 = vmatprep.subr.bf16.mxu0 %v3637_v20  ;;  %1175 = vmatprep.subr.bf16.mxu1 %v3640_v21  ;;  %v3661_v36 = vld [vmem:[%s5198_s3 + $0x4] ss:$24 sps:$4 sm:$0xff]   ;;  %v3663_v38 = vld [vmem:[%s5198_s3] ss:$24 sps:$4 sm:$0xff]   ;;  %v3667_v40 = vld [vmem:[%s5198_s3 + $0x2d4] ss:$24 sps:$4 sm:$0xff]  }
  0x18   : > { %v3666_v39 = vld [vmem:[%s5198_s3 + $0x8] ss:$24 sps:$4 sm:$0xff]   ;;  %v3670_v41 = vld [vmem:[%s5198_s3 + $0x2dc] ss:$24 sps:$4 sm:$0xff]   ;;  %v3672_v59 = vld [vmem:[%s5198_s3 + $0x2d8] ss:$24 sps:$4 sm:$0xff]  }
  0x19   : > { %1133 = vmatpush1.bf16.msra.mxu0 %v3639_v22  ;;  %v3669_v42 = vld [vmem:[%s5198_s3 + $0x2d0] ss:$24 sps:$4 sm:$0xff]   ;;  %v3673_v60 = vld [vmem:[%s5198_s3 + $0x2a4] ss:$24 sps:$4 sm:$0xff]   ;;  %v3675_v61 = vld [vmem:[%s5198_s3 + $0x2a0] ss:$24 sps:$4 sm:$0xff]  }
  0x1a   : > { %1176 = vmatpush1.bf16.msra.mxu1 %v3642_v23  ;;  %1134 = vmatprep.subr.bf16.mxu0 %v3643_v24  ;;  %v3676_v62 = vld [vmem:[%s5198_s3 + $0x2ac] ss:$24 sps:$4 sm:$0xff]   ;;  %v3678_v63 = vld [vmem:[%s5198_s3 + $0x2a8] ss:$24 sps:$4 sm:$0xff]   ;;  %v3684_v3 = vld [vmem:[%s5198_s3 + $0x278] ss:$24 sps:$4 sm:$0xff]  }
  0x1b   : > { %1177 = vmatprep.subr.bf16.mxu1 %v3646_v25  ;;  %v3685_v4 = vld [vmem:[%s5198_s3 + $0x244] ss:$24 sps:$4 sm:$0xff]   ;;  %v3690_v7 = vld [vmem:[%s5198_s3 + $0x248] ss:$24 sps:$4 sm:$0xff]   ;;  %v3691_v8 = vld [vmem:[%s5198_s3 + $0x214] ss:$24 sps:$4 sm:$0xff]  }
  0x1c   : > { %v3688_v6 = vld [vmem:[%s5198_s3 + $0x24c] ss:$24 sps:$4 sm:$0xff]   ;;  %v3694_v9 = vld [vmem:[%s5198_s3 + $0x21c] ss:$24 sps:$4 sm:$0xff]   ;;  %v3693_v10 = vld [vmem:[%s5198_s3 + $0x210] ss:$24 sps:$4 sm:$0xff]  }
  0x1d   : > { %1135 = vmatpush1.bf16.msra.mxu0 %v3645_v26  ;;  %v3696_v11 = vld [vmem:[%s5198_s3 + $0x218] ss:$24 sps:$4 sm:$0xff]   ;;  %v3697_v12 = vld [vmem:[%s5198_s3 + $0x1e4] ss:$24 sps:$4 sm:$0xff]   ;;  %v3702_v15 = vld [vmem:[%s5198_s3 + $0x1e8] ss:$24 sps:$4 sm:$0xff]  }
  0x1e   : > { %1178 = vmatpush1.bf16.msra.mxu1 %v3648_v27  ;;  %1136 = vmatprep.subr.bf16.mxu0 %v3649_v28  ;;  %v3700_v13 = vld [vmem:[%s5198_s3 + $0x1ec] ss:$24 sps:$4 sm:$0xff]   ;;  %v3699_v14 = vld [vmem:[%s5198_s3 + $0x1e0] ss:$24 sps:$4 sm:$0xff]   ;;  %v3706_v17 = vld [vmem:[%s5198_s3 + $0x1bc] ss:$24 sps:$4 sm:$0xff]  }
  0x1f   : > { %1179 = vmatprep.subr.bf16.mxu1 %v3652_v29  ;;  %v3703_v16 = vld [vmem:[%s5198_s3 + $0x1b4] ss:$24 sps:$4 sm:$0xff]   ;;  %v3705_v18 = vld [vmem:[%s5198_s3 + $0x1b0] ss:$24 sps:$4 sm:$0xff]   ;;  %v3709_v20 = vld [vmem:[%s5198_s3 + $0x184] ss:$24 sps:$4 sm:$0xff]  }
  0x20   : > { %v3708_v19 = vld [vmem:[%s5198_s3 + $0x1b8] ss:$24 sps:$4 sm:$0xff]   ;;  %v3712_v21 = vld [vmem:[%s5198_s3 + $0x18c] ss:$24 sps:$4 sm:$0xff]   ;;  %v3714_v23 = vld [vmem:[%s5198_s3 + $0x188] ss:$24 sps:$4 sm:$0xff]  }
  0x21   : > { %1137 = vmatpush1.bf16.msra.mxu0 %v3651_v30  ;;  %v3711_v22 = vld [vmem:[%s5198_s3 + $0x180] ss:$24 sps:$4 sm:$0xff]   ;;  %v3717_v24 = vld [vmem:[%s5198_s3 + $0x164] ss:$24 sps:$4 sm:$0xff]   ;;  %vm1508_vm4 = vcmask 97280   ;;  %vm1512_vm5 = vcmask 93184  }
  0x22   : > { %1180 = vmatpush1.bf16.msra.mxu1 %v3654_v31  ;;  %1138 = vmatprep.subr.bf16.mxu0 %v3655_v32  ;;  %v487_v31 = vlaneseq }
  0x23   : > { %1181 = vmatprep.subr.bf16.mxu1 %v3658_v33 }
  0x24   : > { %v4397_v32 = vshrl.u32 %v487_v31, 7 }
  0x25   : > { %1139 = vmatpush1.bf16.msra.mxu0 %v3657_v34 }
  0x26   : > { %1182 = vmatpush1.bf16.msra.mxu1 %v3660_v35  ;;  %1140 = vmatprep.subr.bf16.mxu0 %v3661_v36  ;;  %v4400_v33 = vsub.s32 1, %v4397_v32  ;;  %v4403_v34 = vsub.s32 0, %v4397_v32  ;;  %v446_v35 = vld [vmem:[%s5196_s1] sm:$0x3] }
  0x27   : > { %1183 = vmatprep.subr.bf16.mxu1 %v3664_v37  ;;  %v447_v37 = vld [vmem:[%s5197_s2] sm:$0x3] }
  0x29   : > { %1141 = vmatpush1.bf16.msra.mxu0 %v3663_v38 }
  0x2a   : > { %1184 = vmatpush1.bf16.msra.mxu1 %v3666_v39  ;;  %1142 = vmatprep.subr.bf16.mxu0 %v3667_v40  ;;  %v494_v39 = vrot.slane %v446_v35, %v4400_v33 }
  0x2b   : > { %1185 = vmatprep.subr.bf16.mxu1 %v3670_v41  ;;  %v490_v41 = vrot.slane %v446_v35, %v4403_v34 }
  0x2d   : > { %1143 = vmatpush2.bf16.msra.mxu0 %v3669_v42 }
  0x2e   : > { %1186 = vmatpush2.bf16.msra.mxu1 %v3672_v59  ;;  %1144 = vmatprep.subr.bf16.mxu0 %v3673_v60  ;;  %v3723_v60 = vld [vmem:[%s5198_s3 + $0x104] ss:$24 sps:$4 sm:$0xff]  }
  0x2f   : > { %1187 = vmatprep.subr.bf16.mxu1 %v3676_v62  ;;  %v3726_v62 = vld [vmem:[%s5198_s3 + $0xd4] ss:$24 sps:$4 sm:$0xff]  }
  0x31   : > { %1145 = vmatpush2.bf16.msra.mxu0 %v3675_v61  ;;  %v3721_v61 = vld [vmem:[%s5198_s3 + $0x100] ss:$24 sps:$4 sm:$0xff]  }
  0x32   : > { %1188 = vmatpush2.bf16.msra.mxu1 %v3678_v63  ;;  %v3724_v63 = vld [vmem:[%s5198_s3 + $0xd0] ss:$24 sps:$4 sm:$0xff]  }
  0x9b   : > { %v456_v43 = vpop.xlane.xlu0 %455 }
  0x9c   : > { %v459_v44 = vmul.f32 0.00390625, %v456_v43  ;;  %v509_v43 = vrot.slane %v447_v37, %v4400_v33 }
  0x9e   : > { %v4286_v45 = vsub.f32 %v4163_v0, %v459_v44  ;;  %v4289_v46 = vsub.f32 %v4166_v1, %v459_v44  ;;  %v3679_v0 = vld [vmem:[%s5198_s3 + $0x274] ss:$24 sps:$4 sm:$0xff]   ;;  %v3681_v1 = vld [vmem:[%s5198_s3 + $0x270] ss:$24 sps:$4 sm:$0xff]   ;;  %v505_v44 = vrot.slane %v447_v37, %v4403_v34 }
  0x9f   : > { %v450_v47 = vpop.xlane.xlu0 %449  ;;  %1146 = vmatprep.subr.bf16.mxu0 %v3679_v0  ;;  %v3729_v0 = vld [vmem:[%s5198_s3 + $0xa4] ss:$24 sps:$4 sm:$0xff]  }
  0xa0   : > { %v458_v48 = vmul.f32 0.00390625, %v450_v47  ;;  %v466_v51 = vmul.f32 %v4286_v45, %v4286_v45  ;;  %v467_v52 = vmul.f32 %v4289_v46, %v4289_v46  ;;  %1147 = vmatpush2.bf16.msra.mxu0 %v3681_v1  ;;  %v3727_v1 = vld [vmem:[%s5198_s3 + $0xa0] ss:$24 sps:$4 sm:$0xff]  }
  0xa1   : > { %1148 = vmatprep.subr.bf16.mxu0 %v3685_v4  ;;  %v3735_v4 = vld [vmem:[%s5198_s3 + $0x44] ss:$24 sps:$4 sm:$0xff]  }
  0xa2   : > { %v4292_v49 = vsub.f32 %v4169_v2, %v458_v48  ;;  %v4295_v50 = vsub.f32 %v4176_v5, %v458_v48  ;;  %v471_v56 = vsel %vm451_vm0, %v466_v51, 0.0  ;;  %v472_v57 = vsel %vm451_vm0, %v467_v52, 0.0  ;;  %v3682_v2 = vld [vmem:[%s5198_s3 + $0x27c] ss:$24 sps:$4 sm:$0xff]   ;;  %v3687_v5 = vld [vmem:[%s5198_s3 + $0x240] ss:$24 sps:$4 sm:$0xff]  }
  0xa3   : > { %v473_v58 = vadd.f32 %v472_v57, %v471_v56  ;;  %1189 = vmatprep.subr.bf16.mxu1 %v3682_v2  ;;  %v3732_v2 = vld [vmem:[%s5198_s3 + $0x74] ss:$24 sps:$4 sm:$0xff]  }
  0xa4   : > { %v464_v53 = vmul.f32 %v4292_v49, %v4292_v49  ;;  %v465_v54 = vmul.f32 %v4295_v50, %v4295_v50  ;;  %1190 = vmatpush2.bf16.msra.mxu1 %v3684_v3  ;;  %1149 = vmatpush2.bf16.msra.mxu0 %v3687_v5  ;;  %v3730_v3 = vld [vmem:[%s5198_s3 + $0x70] ss:$24 sps:$4 sm:$0xff]   ;;  %v3733_v5 = vld [vmem:[%s5198_s3 + $0x40] ss:$24 sps:$4 sm:$0xff]  }
  0xa5   : > { %1191 = vmatprep.subr.bf16.mxu1 %v3688_v6  ;;  %1150 = vmatprep.subr.bf16.mxu0 %v3691_v8  ;;  %v3738_v6 = vld [vmem:[%s5198_s3 + $0x14] ss:$24 sps:$4 sm:$0xff]   ;;  %v3741_v8 = vld [vmem:[%s5198_s3 + $0x2e4] ss:$24 sps:$4 sm:$0xff]  }
  0xa6   : > { %v468_v55 = vadd.f32 %v465_v54, %v464_v53 }
  0xa8   : > { %469 = vadd.xlane.f32.xlu1 %v468_v55  ;;  %1192 = vmatpush2.bf16.msra.mxu1 %v3690_v7  ;;  %v3736_v7 = vld [vmem:[%s5198_s3 + $0x10] ss:$24 sps:$4 sm:$0xff]  }
  0xa9   : > { %1193 = vmatprep.subr.bf16.mxu1 %v3694_v9  ;;  %1151 = vmatpush2.bf16.msra.mxu0 %v3693_v10  ;;  %v3739_v9 = vld [vmem:[%s5198_s3 + $0x2e0] ss:$24 sps:$4 sm:$0xff]   ;;  %v3744_v10 = vld [vmem:[%s5198_s3 + $0x2b4] ss:$24 sps:$4 sm:$0xff]  }
  0xaa   : > { %1152 = vmatprep.subr.bf16.mxu0 %v3697_v12  ;;  %v3747_v12 = vld [vmem:[%s5198_s3 + $0x284] ss:$24 sps:$4 sm:$0xff]  }
  0xac   : > { %474 = vadd.xlane.f32.xlu1 %v473_v58  ;;  %1194 = vmatpush2.bf16.msra.mxu1 %v3696_v11  ;;  %v3715_v58 = vld [vmem:[%s5198_s3 + $0x160] ss:$24 sps:$4 sm:$0xff]   ;;  %v3742_v11 = vld [vmem:[%s5198_s3 + $0x2b0] ss:$24 sps:$4 sm:$0xff]  }
  0xad   : > { %1195 = vmatprep.subr.bf16.mxu1 %v3700_v13  ;;  %1153 = vmatpush2.bf16.msra.mxu0 %v3699_v14  ;;  %v3745_v13 = vld [vmem:[%s5198_s3 + $0x280] ss:$24 sps:$4 sm:$0xff]   ;;  %v3750_v14 = vld [vmem:[%s5198_s3 + $0x254] ss:$24 sps:$4 sm:$0xff]  }
  0xae   : > { %1154 = vmatprep.subr.bf16.mxu0 %v3703_v16  ;;  %v3753_v16 = vld [vmem:[%s5198_s3 + $0x224] ss:$24 sps:$4 sm:$0xff]  }
  0xb0   : > { %1196 = vmatpush2.bf16.msra.mxu1 %v3702_v15  ;;  %v3748_v15 = vld [vmem:[%s5198_s3 + $0x250] ss:$24 sps:$4 sm:$0xff]  }
  0xb1   : > { %1197 = vmatprep.subr.bf16.mxu1 %v3706_v17  ;;  %1155 = vmatpush2.bf16.msra.mxu0 %v3705_v18  ;;  %v3751_v17 = vld [vmem:[%s5198_s3 + $0x220] ss:$24 sps:$4 sm:$0xff]   ;;  %v3756_v18 = vld [vmem:[%s5198_s3 + $0x1f4] ss:$24 sps:$4 sm:$0xff]  }
  0xb2   : > { %1156 = vmatprep.subr.bf16.mxu0 %v3709_v20  ;;  %v3759_v20 = vld [vmem:[%s5198_s3 + $0x1c4] ss:$24 sps:$4 sm:$0xff]  }
  0xb4   : > { %1198 = vmatpush2.bf16.msra.mxu1 %v3708_v19  ;;  %v3754_v19 = vld [vmem:[%s5198_s3 + $0x1f0] ss:$24 sps:$4 sm:$0xff]  }
  0xb5   : > { %1199 = vmatprep.subr.bf16.mxu1 %v3712_v21  ;;  %1157 = vmatpush2.bf16.msra.mxu0 %v3711_v22  ;;  %v3757_v21 = vld [vmem:[%s5198_s3 + $0x1c0] ss:$24 sps:$4 sm:$0xff]   ;;  %v3762_v22 = vld [vmem:[%s5198_s3 + $0x194] ss:$24 sps:$4 sm:$0xff]  }
  0xb6   : > { %1212 = vmatprep.subr.bf16.mxu0 %v3717_v24  ;;  %v4071_v24 = vmov 0.0  }
  0xb8   : > { %1200 = vmatpush2.bf16.msra.mxu1 %v3714_v23  ;;  %v3760_v23 = vld [vmem:[%s5198_s3 + $0x190] ss:$24 sps:$4 sm:$0xff]  }
  0xb9   : > { %3520 = vmatprep.subr.bf16.mxu1 %v4071_v24 }
 0x131   : > { %v470_v25 = vpop.xlane.xlu1 %469 }
 0x132   : > { %v476_v26 = vmul.f32 0.00390625, %v470_v25  ;;  %v626_v25 = vsub.s32 2, %v4397_v32 }
 0x134   : > { %v478_v27 = vadd.f32 1e-12, %v476_v26  ;;  %v614_v26 = vld [vmem:[%s5199_s4] sm:$0x3f] }
 0x135   : > { %v475_v28 = vpop.xlane.xlu1 %474  ;;  %v627_v31 = vrot.slane %v614_v26, %v626_v25  ;;  %v623_v37 = vrot.slane %v614_v26, %v4400_v33 }
 0x136   : > { %4003 = vrsqrt.f32 %v478_v27  ;;  %v477_v29 = vmul.f32 0.00390625, %v475_v28 }
 0x138   : > { %v479_v30 = vadd.f32 1e-12, %v477_v29  ;;  %v630_v29 = vsub.s32 3, %v4397_v32 }
 0x13a   : > { %4005 = vrsqrt.f32 %v479_v30  ;;  %v619_v30 = vrot.slane %v614_v26, %v4403_v34 }
 0x143   : > { %v4004_v36 = vpop.eup %4003 }
 0x144   : > { %v483_v38 = vmul.f32 %v4004_v36, %v4295_v50  ;;  %v482_v40 = vmul.f32 %v4004_v36, %v4292_v49 }
 0x146   : > { %v498_v48 = vmul.f32 %v494_v39, %v483_v38  ;;  %v497_v52 = vmul.f32 %v490_v41, %v482_v40  ;;  %v631_v38 = vrot.slane %v614_v26, %v630_v29 }
 0x147   : > { %v4006_v42 = vpop.eup %4005 }
 0x148   : > { %v485_v47 = vmul.f32 %v4006_v42, %v4289_v46  ;;  %v484_v51 = vmul.f32 %v4006_v42, %v4286_v45  ;;  %v513_v50 = vadd.f32 %v509_v43, %v498_v48  ;;  %v512_v56 = vadd.f32 %v505_v44, %v497_v52  ;;  %v3720_v46 = vld [vmem:[%s5198_s3 + $0x134] ss:$24 sps:$4 sm:$0xff]   ;;  %v3718_v45 = vld [vmem:[%s5198_s3 + $0x130] ss:$24 sps:$4 sm:$0xff]  }
 0x14a   : > { %v500_v53 = vmul.f32 %v494_v39, %v485_v47  ;;  %v499_v54 = vmul.f32 %v490_v41, %v484_v51 }
 0x14c   : > { %v515_v55 = vadd.f32 %v509_v43, %v500_v53  ;;  %v514_v57 = vadd.f32 %v505_v44, %v499_v54 }
 0x14e   : > { %v517_v49 = vpack.c.bf16 %v515_v55, %v513_v50  ;;  %v4422_v59 = vpack.c.bf16 %v514_v57, %v512_v56 }
 0x150   : > { %1158 = vmatprep.mubr.bf16.mxu0 %v517_v49  ;;  %1201 = vmatprep.mubr.bf16.mxu1 %v517_v49 }
 0x151   : > { %1159 = vmatmul.mubr.bf16.vlgmr.msra.gmra.mxu0 %v4422_v59  ;;  %1202 = vmatmul.mubr.bf16.vlgmr.msra.gmra.mxu1 %v4422_v59 }
 0x152   : > { %1213 = vmatpush1.bf16.msra.mxu0 %v3715_v58  ;;  %1244 = vmatprep.mubr.bf16.mxu0 %v517_v49 }
 0x153   : > { %1214 = vmatprep.subr.bf16.mxu0 %v3720_v46  ;;  %3522 = vmatprep.mubr.msk.bf16.mxu1 %vm4072_vm1, %v4071_v24 }
 0x156   : > { %1215 = vmatpush1.bf16.msra.mxu0 %v3718_v45 }
 0x157   : > { %1216 = vmatprep.subr.bf16.mxu0 %v3723_v60  ;;  %v634_v60 = vsub.s32 4, %v4397_v32 }
 0x15a   : > { %1217 = vmatpush1.bf16.msra.mxu0 %v3721_v61  ;;  %v638_v61 = vsub.s32 5, %v4397_v32 }
 0x15b   : > { %1218 = vmatprep.subr.bf16.mxu0 %v3726_v62 }
 0x15e   : > { %1219 = vmatpush1.bf16.msra.mxu0 %v3724_v63  ;;  %v635_v63 = vrot.slane %v614_v26, %v634_v60 }
 0x15f   : > { %1220 = vmatprep.subr.bf16.mxu0 %v3729_v0 }
 0x162   : > { %1221 = vmatpush1.bf16.msra.mxu0 %v3727_v1  ;;  %v639_v1 = vrot.slane %v614_v26, %v638_v61 }
 0x163   : > { %1222 = vmatprep.subr.bf16.mxu0 %v3732_v2 }
 0x166   : > { %1223 = vmatpush1.bf16.msra.mxu0 %v3730_v3 }
 0x167   : > { %1224 = vmatprep.subr.bf16.mxu0 %v3735_v4 }
 0x16a   : > { %1225 = vmatpush1.bf16.msra.mxu0 %v3733_v5 }
 0x16b   : > { %1226 = vmatprep.subr.bf16.mxu0 %v3738_v6 }
 0x16e   : > { %1227 = vmatpush1.bf16.msra.mxu0 %v3736_v7 }
 0x16f   : > { %1228 = vmatprep.subr.bf16.mxu0 %v3741_v8 }
 0x172   : > { %1229 = vmatpush2.bf16.msra.mxu0 %v3739_v9 }
 0x173   : > { %1230 = vmatprep.subr.bf16.mxu0 %v3744_v10 }
 0x176   : > { %1231 = vmatpush2.bf16.msra.mxu0 %v3742_v11 }
 0x177   : > { %1232 = vmatprep.subr.bf16.mxu0 %v3747_v12 }
 0x17a   : > { %1233 = vmatpush2.bf16.msra.mxu0 %v3745_v13 }
 0x17b   : > { %1234 = vmatprep.subr.bf16.mxu0 %v3750_v14 }
 0x17e   : > { %1235 = vmatpush2.bf16.msra.mxu0 %v3748_v15 }
 0x17f   : > { %1236 = vmatprep.subr.bf16.mxu0 %v3753_v16 }
 0x182   : > { %1237 = vmatpush2.bf16.msra.mxu0 %v3751_v17 }
 0x183   : > { %1238 = vmatprep.subr.bf16.mxu0 %v3756_v18 }
 0x186   : > { %1239 = vmatpush2.bf16.msra.mxu0 %v3754_v19 }
 0x187   : > { %1240 = vmatprep.subr.bf16.mxu0 %v3759_v20 }
 0x18a   : > { %1241 = vmatpush2.bf16.msra.mxu0 %v3757_v21 }
 0x18b   : > { %1242 = vmatprep.subr.bf16.mxu0 %v3762_v22 }
 0x18e   : > { %1243 = vmatpush2.bf16.msra.mxu0 %v3760_v23 }
 0x191   : > { %1245 = vmatmul.mubr.bf16.vlgmr.msra.gmra.mxu0 %v4422_v59 }
 0x211   : > { %v1160_v27 = vpop.f32.mrf.mxu0  ;;  %v1203_v28 = vpop.f32.mrf.mxu1 }
 0x212   : > { %v1161_v41 = vadd.f32 %v1160_v27, %v619_v30  ;;  %v1204_v42 = vadd.f32 %v1203_v28, %v627_v31 }
 0x213   : > { %v1162_v35 = vpop.f32.mrf.mxu0  ;;  %v1205_v36 = vpop.f32.mrf.mxu1 }
 0x214   : > { %v1163_v54 = vadd.f32 %v1162_v35, %v623_v37  ;;  %v1206_v50 = vadd.f32 %v1205_v36, %v631_v38 }
 0x215   : > { %v1164_v39 = vpop.f32.mrf.mxu0  ;;  %v1207_v40 = vpop.f32.mrf.mxu1 }
 0x216   : > { %v1165_v43 = vadd.f32 %v1164_v39, %v619_v30  ;;  %v1208_v44 = vadd.f32 %v1207_v40, %v627_v31 }
 0x217   : > { %v1166_v47 = vpop.f32.mrf.mxu0  ;;  %v1209_v48 = vpop.f32.mrf.mxu1 }
 0x218   : > { %v3584_v51 = vpack.i.bf16 %v1165_v43, %v1161_v41  ;;  %v3579_v52 = vpack.i.bf16 %v1208_v44, %v1204_v42  ;;  %v1307_v53 = vpack.c.bf16 %v1208_v44, %v1204_v42  ;;  %v1167_v55 = vadd.f32 %v1166_v47, %v623_v37 }
 0x219   : > { %v1210_v56 = vadd.f32 %v1209_v48, %v631_v38  ;;  %v1303_v46 = vpack.c.bf16 %v1165_v43, %v1161_v41 }
 0x21a   : > { %3580 = vrot.lane.b32.xlu0 %v3579_v52, %s4073_s17  ;;  %3585 = vrot.lane.b32.xlu1 %v3584_v51, %s4073_s17  ;;  %v1316_v57 = vsel %vm1311_vm2, %v1307_v53, 0  ;;  %v1305_v49 = vpack.c.bf16 %v1167_v55, %v1163_v54  ;;  %v3594_v45 = vpack.i.bf16 %v1167_v55, %v1163_v54 }
 0x21b   : > { %v1309_v58 = vpack.c.bf16 %v1210_v56, %v1206_v50  ;;  %3521 = vmatpush3.bf16.xpose.msra.mxu1 %v1316_v57  ;;  %v3589_v59 = vpack.i.bf16 %v1210_v56, %v1206_v50 }
 0x21c   : > { %3526 = vmatprep.subr.bf16.mxu1 %v4071_v24 }
 0x21d   : > { %v1410_v22 = vsel %vm1311_vm2, %v1309_v58, 0 }
 0x21e   : > { %3590 = vrot.lane.b32.xlu1 %v3589_v59, %s4073_s17 }
 0x222   : > { %3595 = vrot.lane.b32.xlu1 %v3594_v45, %s4073_s17  ;;  %3523 = vmatmul.mubr.msk.bf16.vlgmr.msra.gmra.mxu1 %vm1311_vm2, %v1303_v46 }
 0x223   : > { %3528 = vmatprep.mubr.msk.bf16.mxu1 %vm4072_vm1, %v4071_v24 }
 0x251   : > { %v1246_v62 = vpop.f32.mrf.mxu0 }
 0x252   : > { %v4542_v3 = vadd.f32 %v1246_v62, %v635_v63 }
 0x253   : > { %v1248_v0 = vpop.f32.mrf.mxu0 }
 0x254   : > { %v4546_v6 = vadd.f32 %v1248_v0, %v639_v1 }
 0x255   : > { %v1250_v2 = vpop.f32.mrf.mxu0 }
 0x256   : > { %v4544_v4 = vadd.f32 %v1250_v2, %v635_v63 }
 0x257   : > { %v1252_v5 = vpop.f32.mrf.mxu0 }
 0x258   : > { %v3599_v7 = vpack.i.bf16 %v4544_v4, %v4542_v3  ;;  %v4550_v8 = vadd.f32 %v1252_v5, %v639_v1  ;;  %v1602_v31 = vpack.c.bf16 %v4544_v4, %v4542_v3 }
 0x25a   : > { %v1604_v9 = vpack.c.bf16 %v4550_v8, %v4546_v6  ;;  %v1611_v36 = vsel %vm1609_vm3, %v1602_v31, 0 }
 0x28c   : > { %v3581_v10 = vpop.permute.xlu0 %3580  ;;  %v3586_v14 = vpop.permute.xlu1 %3585 }
 0x28d   : > { %v3583_v11 = vunpack.i.h.bf16 %v3581_v10  ;;  %v3582_v12 = vunpack.i.l.bf16 %v3581_v10  ;;  %v3588_v16 = vunpack.i.h.bf16 %v3586_v14  ;;  %v3587_v17 = vunpack.i.l.bf16 %v3586_v14 }
 0x28f   : > { %v1308_v13 = vpack.c.bf16 %v3583_v11, %v3582_v12  ;;  %v1304_v19 = vpack.c.bf16 %v3588_v16, %v3587_v17 }
 0x290   : > { %v3591_v18 = vpop.permute.xlu1 %3590 }
 0x291   : > { %v1363_v15 = vsel %vm1311_vm2, %v1308_v13, 0  ;;  %v3593_v20 = vunpack.i.h.bf16 %v3591_v18  ;;  %v3592_v21 = vunpack.i.l.bf16 %v3591_v18 }
 0x292   : > { %3527 = vmatpush3.bf16.xpose.msra.mxu1 %v1363_v15 }
 0x293   : > { %3532 = vmatprep.subr.bf16.mxu1 %v4071_v24  ;;  %v1310_v23 = vpack.c.bf16 %v3593_v20, %v3592_v21 }
 0x294   : > { %v3596_v26 = vpop.permute.xlu1 %3595 }
 0x295   : > { %v1457_v27 = vsel %vm1311_vm2, %v1310_v23, 0  ;;  %v3598_v28 = vunpack.i.h.bf16 %v3596_v26  ;;  %v3597_v30 = vunpack.i.l.bf16 %v3596_v26 }
 0x297   : > { %v1306_v35 = vpack.c.bf16 %v3598_v28, %v3597_v30 }
 0x299   : > { %3529 = vmatmul.mubr.msk.bf16.vlgmr.msra.gmra.mxu1 %vm1311_vm2, %v1304_v19 }
 0x29a   : > { %3533 = vmatpush3.bf16.xpose.msra.mxu1 %v1410_v22  ;;  %3534 = vmatprep.mubr.msk.bf16.mxu1 %vm4072_vm1, %v4071_v24 }
 0x29b   : > { %3538 = vmatprep.subr.bf16.mxu1 %v4071_v24 }
 0x2a1   : > { %3535 = vmatmul.mubr.msk.bf16.vlgmr.msra.gmra.mxu1 %vm1311_vm2, %v1305_v49 }
 0x2a2   : > { %3539 = vmatpush3.bf16.xpose.msra.mxu1 %v1457_v27  ;;  %3540 = vmatprep.mubr.msk.bf16.mxu1 %vm4072_vm1, %v4071_v24 }
 0x2a3   : > { %3544 = vmatprep.subr.bf16.mxu1 %v4071_v24 }
 0x2a9   : > { %3541 = vmatmul.mubr.msk.bf16.vlgmr.msra.gmra.mxu1 %vm1311_vm2, %v1306_v35 }
 0x2aa   : > { %3545 = vmatpush3.bf16.msra.mxu1 %v1611_v36  ;;  %3546 = vmatprep.mubr.msk.bf16.mxu1 %vm4072_vm1, %v4071_v24 }
 0x2ab   : > { %3550 = vmatprep.subr.bf16.mxu1 %v4071_v24 }
 0x2e2   : > { %v1352_v37 = vpop.f32.mrf.mxu1 }
 0x2e3   : > { %v1500_v38 = vmul.f32 0.125, %v1352_v37 }
 0x2e4   : > { %v3524_v39 = vpop.f32.mrf.mxu1 }
 0x2e5   : > { %v1509_v40 = vsel %vm1508_vm4, %v1500_v38, -inf }
 0x2e6   : > { %1510 = vmax.xlane.f32.xlu0 %v1509_v40  ;;  %v1355_v41 = vpop.f32.mrf.mxu1 }
 0x2e7   : > { %v1501_v42 = vmul.f32 0.125, %v1355_v41 }
 0x2e8   : > { %v3525_v43 = vpop.f32.mrf.mxu1 }
 0x2e9   : > { %v1513_v44 = vsel %vm1512_vm5, %v1501_v42, -inf }
 0x2ea   : > { %1514 = vmax.xlane.f32.xlu1 %v1513_v44 }
 0x359   : > { %v1399_v47 = vpop.f32.mrf.mxu1 }
 0x35a   : > { %v1502_v48 = vmul.f32 0.125, %v1399_v47 }
 0x35b   : > { %v3530_v51 = vpop.f32.mrf.mxu1 }
 0x35c   : > { %v1516_v52 = vsel %vm1508_vm4, %v1502_v48, -inf }
 0x35d   : > { %1517 = vmax.xlane.f32.xlu0 %v1516_v52  ;;  %v1402_v53 = vpop.f32.mrf.mxu1 }
 0x35e   : > { %v1503_v54 = vmul.f32 0.125, %v1402_v53 }
 0x35f   : > { %v3531_v50 = vpop.f32.mrf.mxu1 }
 0x360   : > { %v1519_v55 = vsel %vm1512_vm5, %v1503_v54, -inf }
 0x361   : > { %1520 = vmax.xlane.f32.xlu0 %v1519_v55  ;;  %v1446_v56 = vpop.f32.mrf.mxu1 }
 0x362   : > { %v1504_v57 = vmul.f32 0.125, %v1446_v56 }
 0x363   : > { %v3536_v49 = vpop.f32.mrf.mxu1 }
 0x364   : > { %v1522_v58 = vsel %vm1508_vm4, %v1504_v57, -inf }
 0x365   : > { %1523 = vmax.xlane.f32.xlu0 %v1522_v58  ;;  %v1449_v59 = vpop.f32.mrf.mxu1 }
 0x366   : > { %v1505_v46 = vmul.f32 0.125, %v1449_v59 }
 0x367   : > { %v3537_v45 = vpop.f32.mrf.mxu1 }
 0x368   : > { %v1525_v60 = vsel %vm1512_vm5, %v1505_v46, -inf }
 0x369   : > { %1526 = vmax.xlane.f32.xlu1 %v1525_v60  ;;  %v1493_v61 = vpop.f32.mrf.mxu1  ;;  %v3604_v60 = vpack.i.bf16 %v4550_v8, %v4546_v6 }
 0x36a   : > { %v1506_v62 = vmul.f32 0.125, %v1493_v61 }
 0x36b   : > { %v3542_v63 = vpop.f32.mrf.mxu1 }
 0x36c   : > { %v1528_v0 = vsel %vm1508_vm4, %v1506_v62, -inf }
 0x36d   : > { %1529 = vmax.xlane.f32.xlu0 %v1528_v0  ;;  %v1496_v1 = vpop.f32.mrf.mxu1 }
 0x36e   : > { %v1507_v2 = vmul.f32 0.125, %v1496_v1 }
 0x36f   : > { %v1511_v5 = vpop.xlane.xlu0 %1510  ;;  %v3543_v10 = vpop.f32.mrf.mxu1 }
 0x370   : > { %v1534_v11 = vsub.f32 %v1500_v38, %v1511_v5  ;;  %v1531_v12 = vsel %vm1512_vm5, %v1507_v2, -inf }
 0x371   : > { %1532 = vmax.xlane.f32.xlu1 %v1531_v12 }
 0x372   : > { %v1542_v13 = vmul.f32 1.442695, %v1534_v11 }
 0x373   : > { %v1515_v14 = vpop.xlane.xlu1 %1514 }
 0x374   : > { %4007 = vpow2.f32 %v1542_v13  ;;  %v1535_v15 = vsub.f32 %v1501_v42, %v1515_v14 }
 0x376   : > { %v1544_v16 = vmul.f32 1.442695, %v1535_v15 }
 0x378   : > { %4009 = vpow2.f32 %v1544_v16 }
 0x381   : > { %v4008_v17 = vpop.eup %4007 }
 0x382   : > { %v1558_v18 = vsel %vm1508_vm4, %v4008_v17, 0.0 }
 0x383   : > { %1559 = vadd.xlane.f32.xlu0 %v1558_v18 }
 0x385   : > { %v4010_v19 = vpop.eup %4009 }
 0x386   : > { %v1561_v20 = vsel %vm1512_vm5, %v4010_v19, 0.0 }
 0x387   : > { %1562 = vadd.xlane.f32.xlu1 %v1561_v20 }
 0x3e6   : > { %v1518_v21 = vpop.xlane.xlu0 %1517 }
 0x3e7   : > { %v1536_v22 = vsub.f32 %v1502_v48, %v1518_v21 }
 0x3e9   : > { %v1546_v23 = vmul.f32 1.442695, %v1536_v22 }
 0x3ea   : > { %v1521_v26 = vpop.xlane.xlu0 %1520 }
 0x3eb   : > { %4011 = vpow2.f32 %v1546_v23  ;;  %v1537_v27 = vsub.f32 %v1503_v54, %v1521_v26  ;;  %v1705_v26 = vsel %vm1609_vm3, %v1604_v9, 0 }
 0x3ed   : > { %v1548_v28 = vmul.f32 1.442695, %v1537_v27 }
 0x3ee   : > { %v1524_v30 = vpop.xlane.xlu0 %1523 }
 0x3ef   : > { %4013 = vpow2.f32 %v1548_v28  ;;  %v1538_v31 = vsub.f32 %v1504_v57, %v1524_v30 }
 0x3f1   : > { %v1550_v35 = vmul.f32 1.442695, %v1538_v31 }
 0x3f2   : > { %v1527_v36 = vpop.xlane.xlu1 %1526 }
 0x3f3   : > { %4015 = vpow2.f32 %v1550_v35  ;;  %v1539_v37 = vsub.f32 %v1505_v46, %v1527_v36 }
 0x3f5   : > { %v1552_v38 = vmul.f32 1.442695, %v1539_v37 }
 0x3f6   : > { %v1530_v39 = vpop.xlane.xlu0 %1529 }
 0x3f7   : > { %4017 = vpow2.f32 %v1552_v38  ;;  %v1540_v40 = vsub.f32 %v1506_v62, %v1530_v39 }
 0x3f8   : > { %v4012_v41 = vpop.eup %4011 }
 0x3f9   : > { %v1554_v42 = vmul.f32 1.442695, %v1540_v40  ;;  %v1564_v43 = vsel %vm1508_vm4, %v4012_v41, 0.0 }
 0x3fa   : > { %1565 = vadd.xlane.f32.xlu0 %v1564_v43  ;;  %v1533_v44 = vpop.xlane.xlu1 %1532  ;;  %v3763_v43 = vld [vmem:[%s5200_s5 + $0x70] ss:$8 sps:$4 sm:$0xff]  }
 0x3fb   : > { %4019 = vpow2.f32 %v1554_v42  ;;  %v1541_v47 = vsub.f32 %v1507_v2, %v1533_v44  ;;  %v3768_v44 = vld [vmem:[%s5200_s5 + $0x64] ss:$8 sps:$4 sm:$0xff]  }
 0x3fc   : > { %v4014_v48 = vpop.eup %4013 }
 0x3fd   : > { %v1556_v51 = vmul.f32 1.442695, %v1541_v47  ;;  %v1567_v52 = vsel %vm1512_vm5, %v4014_v48, 0.0  ;;  %v3766_v47 = vld [vmem:[%s5200_s5 + $0x60] ss:$8 sps:$4 sm:$0xff]  }
 0x3fe   : > { %1568 = vadd.xlane.f32.xlu1 %v1567_v52  ;;  %v3774_v52 = vld [vmem:[%s5200_s5 + $0x44] ss:$8 sps:$4 sm:$0xff]  }
 0x3ff   : > { %4021 = vpow2.f32 %v1556_v51  ;;  %v3769_v51 = vld [vmem:[%s5200_s5 + $0x50] ss:$8 sps:$4 sm:$0xff]  }
 0x400   : > { %v4016_v53 = vpop.eup %4015 }
 0x401   : > { %v1570_v54 = vsel %vm1508_vm4, %v4016_v53, 0.0 }
 0x402   : > { %1571 = vadd.xlane.f32.xlu0 %v1570_v54  ;;  %v3777_v54 = vld [vmem:[%s5200_s5 + $0x34] ss:$8 sps:$4 sm:$0xff]  }
 0x404   : > { %v4018_v50 = vpop.eup %4017 }
 0x405   : > { %v1573_v55 = vsel %vm1512_vm5, %v4018_v50, 0.0 }
 0x406   : > { %1574 = vadd.xlane.f32.xlu1 %v1573_v55  ;;  %v3780_v55 = vld [vmem:[%s5200_s5 + $0x24] ss:$8 sps:$4 sm:$0xff]  }
 0x408   : > { %v4587_v56 = vpop.eup %4019 }
 0x409   : > { %v1576_v57 = vsel %vm1508_vm4, %v4587_v56, 0.0 }
 0x40a   : > { %1577 = vadd.xlane.f32.xlu0 %v1576_v57  ;;  %v3783_v57 = vld [vmem:[%s5200_s5 + $0x14] ss:$8 sps:$4 sm:$0xff]  }
 0x40c   : > { %v4022_v49 = vpop.eup %4021  ;;  %v1560_v58 = vpop.xlane.xlu0 %1559 }
 0x40d   : > { %v1579_v59 = vsel %vm1512_vm5, %v4022_v49, 0.0  ;;  %4023 = vrcp.f32 %v1560_v58  ;;  %v3786_v58 = vld [vmem:[%s5200_s5 + $0x4] ss:$8 sps:$4 sm:$0xff]  }
 0x40e   : > { %1580 = vadd.xlane.f32.xlu1 %v1579_v59  ;;  %v3784_v59 = vld [vmem:[%s5200_s5] ss:$8 sps:$4 sm:$0xff]  }
 0x410   : > { %v1563_v46 = vpop.xlane.xlu1 %1562 }
 0x411   : > { %4025 = vrcp.f32 %v1563_v46  ;;  %v3789_v46 = vld [vmem:[%s5200_s5 + $0xf4] ss:$8 sps:$4 sm:$0xff]  }
 0x41a   : > { %v4024_v45 = vpop.eup %4023 }
 0x41b   : > { %v1590_v62 = vmul.f32 %v4024_v45, %v4008_v17  ;;  %v3787_v45 = vld [vmem:[%s5200_s5 + $0xf0] ss:$8 sps:$4 sm:$0xff]  }
 0x41e   : > { %v4026_v61 = vpop.eup %4025 }
 0x41f   : > { %3605 = vrot.lane.b32.xlu1 %v3604_v60, %s4073_s17  ;;  %v1591_v63 = vmul.f32 %v4026_v61, %v4010_v19  ;;  %v3792_v60 = vld [vmem:[%s5200_s5 + $0xe4] ss:$8 sps:$4 sm:$0xff]   ;;  %v3790_v61 = vld [vmem:[%s5200_s5 + $0xe0] ss:$8 sps:$4 sm:$0xff]  }
 0x420   : > { %3600 = vrot.lane.b32.xlu0 %v3599_v7, %s4073_s17 }
 0x421   : > { %v1598_v0 = vpack.c.bf16 %v1591_v63, %v1590_v62  ;;  %v3795_v62 = vld [vmem:[%s5200_s5 + $0xd4] ss:$8 sps:$4 sm:$0xff]   ;;  %v3793_v63 = vld [vmem:[%s5200_s5 + $0xd0] ss:$8 sps:$4 sm:$0xff]  }
 0x423   : > { %3547 = vmatmul.mubr.msk.bf16.vlgmr.msra.gmra.mxu1 %vm1508_vm4, %v1598_v0  ;;  %v3798_v0 = vld [vmem:[%s5200_s5 + $0xc4] ss:$8 sps:$4 sm:$0xff]  }
 0x424   : > { %3552 = vmatprep.mubr.msk.bf16.mxu1 %vm4072_vm1, %v4071_v24 }
 0x483   : > { %v1566_v2 = vpop.xlane.xlu0 %1565 }
 0x487   : > { %v1569_v1 = vpop.xlane.xlu1 %1568 }
 0x488   : > { %4027 = vrcp.f32 %v1569_v1  ;;  %v3796_v1 = vld [vmem:[%s5200_s5 + $0xc0] ss:$8 sps:$4 sm:$0xff]  }
 0x489   : > { %4029 = vrcp.f32 %v1566_v2  ;;  %v3801_v2 = vld [vmem:[%s5200_s5 + $0xb4] ss:$8 sps:$4 sm:$0xff]  }
 0x48b   : > { %v1572_v5 = vpop.xlane.xlu0 %1571 }
 0x48f   : > { %v1575_v10 = vpop.xlane.xlu1 %1574 }
 0x490   : > { %4031 = vrcp.f32 %v1575_v10  ;;  %v3804_v10 = vld [vmem:[%s5200_s5 + $0xa4] ss:$8 sps:$4 sm:$0xff]  }
 0x491   : > { %4033 = vrcp.f32 %v1572_v5  ;;  %v3799_v5 = vld [vmem:[%s5200_s5 + $0xb0] ss:$8 sps:$4 sm:$0xff]  }
 0x493   : > { %v1578_v11 = vpop.xlane.xlu0 %1577 }
 0x495   : > { %v4028_v12 = vpop.eup %4027 }
 0x496   : > { %v4030_v7 = vpop.eup %4029  ;;  %v1593_v16 = vmul.f32 %v4028_v12, %v4014_v48  ;;  %v3771_v48 = vld [vmem:[%s5200_s5 + $0x54] ss:$8 sps:$4 sm:$0xff]  }
 0x497   : > { %v3601_v13 = vpop.permute.xlu0 %3600  ;;  %v1581_v14 = vpop.xlane.xlu1 %1580  ;;  %v1592_v18 = vmul.f32 %v4030_v7, %v4012_v41 }
 0x498   : > { %v3603_v3 = vunpack.i.h.bf16 %v3601_v13  ;;  %v3602_v4 = vunpack.i.l.bf16 %v3601_v13  ;;  %4035 = vrcp.f32 %v1581_v14 }
 0x499   : > { %4037 = vrcp.f32 %v1578_v11  ;;  %v1599_v20 = vpack.c.bf16 %v1593_v16, %v1592_v18  ;;  %v3802_v11 = vld [vmem:[%s5200_s5 + $0xa0] ss:$8 sps:$4 sm:$0xff]   ;;  %v3807_v16 = vld [vmem:[%s5200_s5 + $0x94] ss:$8 sps:$4 sm:$0xff]  }
 0x49a   : > { %v1603_v15 = vpack.c.bf16 %v3603_v3, %v3602_v4 }
 0x49b   : > { %v3606_v19 = vpop.permute.xlu1 %3605 }
 0x49c   : > { %v1658_v17 = vsel %vm1609_vm3, %v1603_v15, 0  ;;  %v3608_v22 = vunpack.i.h.bf16 %v3606_v19  ;;  %v3607_v23 = vunpack.i.l.bf16 %v3606_v19  ;;  %v3805_v15 = vld [vmem:[%s5200_s5 + $0x90] ss:$8 sps:$4 sm:$0xff]   ;;  %v3810_v19 = vld [vmem:[%s5200_s5 + $0x84] ss:$8 sps:$4 sm:$0xff]  }
 0x49d   : > { %3551 = vmatpush3.bf16.msra.mxu1 %v1658_v17  ;;  %v4032_v21 = vpop.eup %4031 }
 0x49e   : > { %3556 = vmatprep.subr.bf16.mxu1 %v4071_v24  ;;  %v4034_v27 = vpop.eup %4033  ;;  %v1595_v28 = vmul.f32 %v4032_v21, %v4018_v50  ;;  %v1605_v30 = vpack.c.bf16 %v3608_v22, %v3607_v23  ;;  %v3775_v50 = vld [vmem:[%s5200_s5 + $0x30] ss:$8 sps:$4 sm:$0xff]  }
 0x49f   : > { %v1594_v31 = vmul.f32 %v4034_v27, %v4016_v53  ;;  %v3772_v53 = vld [vmem:[%s5200_s5 + $0x40] ss:$8 sps:$4 sm:$0xff]  }
 0x4a0   : > { %3553 = vmatmul.mubr.msk.bf16.vlgmr.msra.gmra.mxu1 %vm1508_vm4, %v1599_v20  ;;  %v1752_v37 = vsel %vm1609_vm3, %v1605_v30, 0  ;;  %v3808_v20 = vld [vmem:[%s5200_s5 + $0x80] ss:$8 sps:$4 sm:$0xff]  }
 0x4a1   : > { %3557 = vmatpush3.bf16.msra.mxu1 %v1705_v26  ;;  %3558 = vmatprep.mubr.msk.bf16.mxu1 %vm4072_vm1, %v4071_v24  ;;  %v1600_v35 = vpack.c.bf16 %v1595_v28, %v1594_v31 }
 0x4a2   : > { %3562 = vmatprep.subr.bf16.mxu1 %v4071_v24 }
 0x4a5   : > { %v4036_v36 = vpop.eup %4035 }
 0x4a6   : > { %v4038_v38 = vpop.eup %4037  ;;  %v1597_v6 = vmul.f32 %v4036_v36, %v4022_v49  ;;  %v3781_v49 = vld [vmem:[%s5200_s5 + $0x10] ss:$8 sps:$4 sm:$0xff]  }
 0x4a7   : > { %v1596_v8 = vmul.f32 %v4038_v38, %v4587_v56  ;;  %v3778_v56 = vld [vmem:[%s5200_s5 + $0x20] ss:$8 sps:$4 sm:$0xff]  }
 0x4a8   : > { %3559 = vmatmul.mubr.msk.bf16.vlgmr.msra.gmra.mxu1 %vm1508_vm4, %v1600_v35 }
 0x4a9   : > { %3563 = vmatpush3.bf16.msra.mxu1 %v1752_v37  ;;  %3564 = vmatprep.mubr.msk.bf16.mxu1 %vm4072_vm1, %v4071_v24  ;;  %v1601_v9 = vpack.c.bf16 %v1597_v6, %v1596_v8  ;;  %v3765_v24 = vld [vmem:[%s5200_s5 + $0x74] ss:$8 sps:$4 sm:$0xff]  }
 0x4aa   : > { %2009 = vmatprep.subr.bf16.mxu0 %v3765_v24  ;;  %v2056_v24 = vld [vmem:[%s5201_s6] sm:$0x3] }
 0x4ab   : > { %2010 = vmatpush1.bf16.msra.mxu0 %v3763_v43 }
 0x4ac   : > { %2011 = vmatprep.subr.bf16.mxu0 %v3768_v44 }
 0x4af   : > { %2012 = vmatpush1.bf16.msra.mxu0 %v3766_v47  ;;  %v4059_v47 = vld [vmem:[%s4160_s30] sm:$0xff] }
 0x4b0   : > { %3565 = vmatmul.mubr.msk.bf16.vlgmr.msra.gmra.mxu1 %vm1508_vm4, %v1601_v9  ;;  %2013 = vmatprep.subr.bf16.mxu0 %v3771_v48 }
 0x4b3   : > { %2014 = vmatpush1.bf16.msra.mxu0 %v3769_v51  ;;  %v2061_v51 = vrot.slane %v2056_v24, %v4403_v34 }
 0x4b4   : > { %2015 = vmatprep.subr.bf16.mxu0 %v3774_v52  ;;  %v2065_v52 = vrot.slane %v2056_v24, %v4400_v33 }
 0x4b7   : > { %2016 = vmatpush1.bf16.msra.mxu0 %v3772_v53 }
 0x4b8   : > { %2017 = vmatprep.subr.bf16.mxu0 %v3777_v54 }
 0x4bb   : > { %2018 = vmatpush1.bf16.msra.mxu0 %v3775_v50 }
 0x4bc   : > { %2019 = vmatprep.subr.bf16.mxu0 %v3780_v55 }
 0x4bf   : > { %2020 = vmatpush1.bf16.msra.mxu0 %v3778_v56  ;;  %v4061_v56 = vld [vmem:[%s4160_s30 + $0x10] sm:$0xf] }
 0x4c0   : > { %2021 = vmatprep.subr.bf16.mxu0 %v3783_v57 }
 0x4c3   : > { %2022 = vmatpush1.bf16.msra.mxu0 %v3781_v49 }
 0x4c4   : > { %2023 = vmatprep.subr.bf16.mxu0 %v3786_v58 }
 0x4c7   : > { %2024 = vmatpush1.bf16.msra.mxu0 %v3784_v59  ;;  %v4062_v59 = vld [vmem:[%s4160_s30 + $0x18] sm:$0xf] }
 0x4c8   : > { %2025 = vmatprep.subr.bf16.mxu0 %v3789_v46 }
 0x4cb   : > { %2026 = vmatpush2.bf16.msra.mxu0 %v3787_v45 }
 0x4cc   : > { %2027 = vmatprep.subr.bf16.mxu0 %v3792_v60 }
 0x4cf   : > { %2028 = vmatpush2.bf16.msra.mxu0 %v3790_v61 }
 0x4d0   : > { %2029 = vmatprep.subr.bf16.mxu0 %v3795_v62 }
 0x4d3   : > { %2030 = vmatpush2.bf16.msra.mxu0 %v3793_v63 }
 0x4d4   : > { %2031 = vmatprep.subr.bf16.mxu0 %v3798_v0  ;;  %v3811_v0 = vld [vmem:[%s5204_s9 + $0xe0] ss:$16 sps:$4 sm:$0xff]  }
 0x4d7   : > { %2032 = vmatpush2.bf16.msra.mxu0 %v3796_v1  ;;  %v3813_v1 = vld [vmem:[%s5204_s9 + $0xe4] ss:$16 sps:$4 sm:$0xff]  }
 0x4d8   : > { %2033 = vmatprep.subr.bf16.mxu0 %v3801_v2  ;;  %v3814_v2 = vld [vmem:[%s5204_s9 + $0xe8] ss:$16 sps:$4 sm:$0xff]   ;;  %2548 = vmatprep.subr.bf16.mxu1 %v3813_v1  ;;  %v3873_v1 = vld [vmem:[%s5204_s9 + $0x1a4] ss:$16 sps:$4 sm:$0xff]  }
 0x4d9   : > { %2549 = vmatpush1.bf16.msra.mxu1 %v3811_v0  ;;  %v3870_v0 = vld [vmem:[%s5204_s9 + $0x1cc] ss:$16 sps:$4 sm:$0xff]  }
 0x4db   : > { %2034 = vmatpush2.bf16.msra.mxu0 %v3799_v5  ;;  %v3816_v5 = vld [vmem:[%s5204_s9 + $0xec] ss:$16 sps:$4 sm:$0xff]  }
 0x4dc   : > { %2035 = vmatprep.subr.bf16.mxu0 %v3804_v10  ;;  %v3819_v10 = vld [vmem:[%s5204_s9 + $0xc4] ss:$16 sps:$4 sm:$0xff]  }
 0x4dd   : > { %2550 = vmatprep.subr.bf16.mxu1 %v3819_v10  ;;  %v3874_v10 = vld [vmem:[%s5204_s9 + $0x1a8] ss:$16 sps:$4 sm:$0xff]  }
 0x4df   : > { %2036 = vmatpush2.bf16.msra.mxu0 %v3802_v11  ;;  %v3822_v11 = vld [vmem:[%s5204_s9 + $0xcc] ss:$16 sps:$4 sm:$0xff]  }
 0x4e0   : > { %2037 = vmatprep.subr.bf16.mxu0 %v3807_v16  ;;  %v3834_v16 = vld [vmem:[%s5204_s9 + $0x8c] ss:$16 sps:$4 sm:$0xff]  }
 0x4e3   : > { %v4618_v39 = vpop.f32.mrf.mxu1  ;;  %2038 = vmatpush2.bf16.msra.mxu0 %v3805_v15  ;;  %v3831_v15 = vld [vmem:[%s5204_s9 + $0x84] ss:$16 sps:$4 sm:$0xff]  }
 0x4e4   : > { %2039 = vmatprep.subr.bf16.mxu0 %v3810_v19  ;;  %v3837_v19 = vld [vmem:[%s5204_s9 + $0x64] ss:$16 sps:$4 sm:$0xff]  }
 0x4e5   : > { %v3548_v40 = vpop.f32.mrf.mxu1 }
 0x4e7   : > { %v4620_v41 = vpop.f32.mrf.mxu1  ;;  %2040 = vmatpush2.bf16.msra.mxu0 %v3808_v20  ;;  %v3840_v20 = vld [vmem:[%s5204_s9 + $0x6c] ss:$16 sps:$4 sm:$0xff]  }
 0x4e8   : > { %2591 = vmatprep.subr.bf16.mxu0 %v3816_v5  ;;  %v3871_v5 = vld [vmem:[%s5204_s9 + $0x1a0] ss:$16 sps:$4 sm:$0xff]  }
 0x4e9   : > { %v3549_v42 = vpop.f32.mrf.mxu1 }
 0x560   : > { %v1694_v12 = vpop.f32.mrf.mxu1 }
 0x562   : > { %v3554_v13 = vpop.f32.mrf.mxu1 }
 0x563   : > { %v3820_v13 = vld [vmem:[%s5204_s9 + $0xc8] ss:$16 sps:$4 sm:$0xff]  }
 0x564   : > { %v1697_v14 = vpop.f32.mrf.mxu1 }
 0x565   : > { %v3614_v28 = vpack.i.bf16 %v1697_v14, %v1694_v12  ;;  %v3817_v12 = vld [vmem:[%s5204_s9 + $0xc0] ss:$16 sps:$4 sm:$0xff]   ;;  %v3825_v14 = vld [vmem:[%s5204_s9 + $0xa4] ss:$16 sps:$4 sm:$0xff]  }
 0x566   : > { %v3555_v3 = vpop.f32.mrf.mxu1  ;;  %2551 = vmatpush1.bf16.msra.mxu1 %v3817_v12  ;;  %v3877_v12 = vld [vmem:[%s5204_s9 + $0x180] ss:$16 sps:$4 sm:$0xff]  }
 0x567   : > { %v3828_v3 = vld [vmem:[%s5204_s9 + $0xac] ss:$16 sps:$4 sm:$0xff]   ;;  %2552 = vmatprep.subr.bf16.mxu1 %v3825_v14  ;;  %v3880_v14 = vld [vmem:[%s5204_s9 + $0x188] ss:$16 sps:$4 sm:$0xff]  }
 0x568   : > { %v1741_v4 = vpop.f32.mrf.mxu1 }
 0x56a   : > { %v3560_v7 = vpop.f32.mrf.mxu1 }
 0x56b   : > { %v3826_v7 = vld [vmem:[%s5204_s9 + $0xa8] ss:$16 sps:$4 sm:$0xff]  }
 0x56c   : > { %v1744_v17 = vpop.f32.mrf.mxu1 }
 0x56e   : > { %v3561_v18 = vpop.f32.mrf.mxu1 }
 0x56f   : > { %v3832_v18 = vld [vmem:[%s5204_s9 + $0x88] ss:$16 sps:$4 sm:$0xff]  }
 0x570   : > { %v1788_v21 = vpop.f32.mrf.mxu1 }
 0x572   : > { %v3566_v22 = vpop.f32.mrf.mxu1 }
 0x573   : > { %v3838_v22 = vld [vmem:[%s5204_s9 + $0x68] ss:$16 sps:$4 sm:$0xff]  }
 0x574   : > { %v1791_v23 = vpop.f32.mrf.mxu1 }
 0x575   : > { %v3609_v26 = vpack.i.bf16 %v1791_v23, %v1788_v21  ;;  %v3835_v21 = vld [vmem:[%s5204_s9 + $0x60] ss:$16 sps:$4 sm:$0xff]   ;;  %v3843_v23 = vld [vmem:[%s5204_s9 + $0x44] ss:$16 sps:$4 sm:$0xff]  }
 0x576   : > { %v3567_v27 = vpop.f32.mrf.mxu1 }
 0x577   : > { %3610 = vrot.lane.b32.xlu1 %v3609_v26, %s4073_s17  ;;  %v3846_v26 = vld [vmem:[%s5204_s9 + $0x4c] ss:$16 sps:$4 sm:$0xff]   ;;  %v3841_v27 = vld [vmem:[%s5204_s9 + $0x40] ss:$16 sps:$4 sm:$0xff]  }
 0x57b   : > { %3615 = vrot.lane.b32.xlu1 %v3614_v28, %s4073_s17  ;;  %v3844_v28 = vld [vmem:[%s5204_s9 + $0x48] ss:$16 sps:$4 sm:$0xff]  }
 0x5e9   : > { %v3611_v30 = vpop.permute.xlu1 %3610 }
 0x5ea   : > { %v3613_v31 = vunpack.i.h.bf16 %v3611_v30  ;;  %v3612_v35 = vunpack.i.l.bf16 %v3611_v30  ;;  %v3849_v30 = vld [vmem:[%s5204_s9 + $0x24] ss:$16 sps:$4 sm:$0xff]  }
 0x5ec   : > { %v1813_v36 = vsel %vm1311_vm2, %v1741_v4, %v3612_v35  ;;  %v1814_v37 = vsel %vm1311_vm2, %v1744_v17, %v3613_v31  ;;  %v3823_v4 = vld [vmem:[%s5204_s9 + $0xa0] ss:$16 sps:$4 sm:$0xff]   ;;  %v3852_v31 = vld [vmem:[%s5204_s9 + $0x2c] ss:$16 sps:$4 sm:$0xff]  }
 0x5ed   : > { %v3616_v38 = vpop.permute.xlu1 %3615  ;;  %v1816_v6 = vpack.c.bf16 %v1814_v37, %v1813_v36  ;;  %2553 = vmatpush1.bf16.msra.mxu1 %v3823_v4  ;;  %v3829_v17 = vld [vmem:[%s5204_s9 + $0x80] ss:$16 sps:$4 sm:$0xff]   ;;  %v3850_v36 = vld [vmem:[%s5204_s9 + $0x28] ss:$16 sps:$4 sm:$0xff]   ;;  %v3855_v37 = vld [vmem:[%s5204_s9 + $0x4] ss:$16 sps:$4 sm:$0xff]  }
 0x5ee   : > { %v3618_v8 = vunpack.i.h.bf16 %v3616_v38  ;;  %v3617_v9 = vunpack.i.l.bf16 %v3616_v38  ;;  %2554 = vmatprep.subr.bf16.mxu1 %v3831_v15  ;;  %v3847_v35 = vld [vmem:[%s5204_s9 + $0x20] ss:$16 sps:$4 sm:$0xff]   ;;  %v3858_v38 = vld [vmem:[%s5204_s9 + $0xc] ss:$16 sps:$4 sm:$0xff]   ;;  %v3886_v15 = vld [vmem:[%s5204_s9 + $0x168] ss:$16 sps:$4 sm:$0xff]  }
 0x5ef   : > { %2041 = vmatprep.mubr.bf16.mxu0 %v1816_v6  ;;  %v3853_v6 = vld [vmem:[%s5204_s9] ss:$16 sps:$4 sm:$0xff]   ;;  %v3888_v4 = vld [vmem:[%s5204_s9 + $0x16c] ss:$16 sps:$4 sm:$0xff]  }
 0x5f0   : > { %v1812_v40 = vsel %vm1311_vm2, %v4620_v41, %v3618_v8  ;;  %v1811_v42 = vsel %vm1311_vm2, %v4618_v39, %v3617_v9  ;;  %v4060_v41 = vld [vmem:[%s4160_s30 + $0x8] sm:$0xff] }
 0x5f1   : > { %v1815_v43 = vpack.c.bf16 %v1812_v40, %v1811_v42  ;;  %2555 = vmatpush1.bf16.msra.mxu1 %v3829_v17  ;;  %v3856_v8 = vld [vmem:[%s5204_s9 + $0x8] ss:$16 sps:$4 sm:$0xff]   ;;  %v3894_v17 = vld [vmem:[%s5204_s9 + $0x14c] ss:$16 sps:$4 sm:$0xff]  }
 0x5f2   : > { %2556 = vmatprep.subr.bf16.mxu1 %v3837_v19  ;;  %v3892_v19 = vld [vmem:[%s5204_s9 + $0x148] ss:$16 sps:$4 sm:$0xff]  }
 0x5f3   : > { %2042 = vmatmul.mubr.bf16.vlgmr.msra.gmra.mxu0 %v1815_v43 }
 0x5f4   : > { %2592 = vmatpush1.bf16.msra.mxu0 %v3814_v2  ;;  %v3876_v2 = vld [vmem:[%s5204_s9 + $0x1ac] ss:$16 sps:$4 sm:$0xff]  }
 0x5f5   : > { %2593 = vmatprep.subr.bf16.mxu0 %v3822_v11  ;;  %2557 = vmatpush1.bf16.msra.mxu1 %v3835_v21  ;;  %v3879_v11 = vld [vmem:[%s5204_s9 + $0x184] ss:$16 sps:$4 sm:$0xff]   ;;  %v3900_v21 = vld [vmem:[%s5204_s9 + $0x12c] ss:$16 sps:$4 sm:$0xff]  }
 0x5f6   : > { %2558 = vmatprep.subr.bf16.mxu1 %v3843_v23  ;;  %v3898_v23 = vld [vmem:[%s5204_s9 + $0x128] ss:$16 sps:$4 sm:$0xff]  }
 0x5f8   : > { %2594 = vmatpush1.bf16.msra.mxu0 %v3820_v13  ;;  %v3882_v13 = vld [vmem:[%s5204_s9 + $0x18c] ss:$16 sps:$4 sm:$0xff]  }
 0x5f9   : > { %2595 = vmatprep.subr.bf16.mxu0 %v3828_v3  ;;  %2559 = vmatpush1.bf16.msra.mxu1 %v3841_v27  ;;  %v3885_v3 = vld [vmem:[%s5204_s9 + $0x164] ss:$16 sps:$4 sm:$0xff]   ;;  %v3906_v27 = vld [vmem:[%s5204_s9 + $0x10c] ss:$16 sps:$4 sm:$0xff]  }
 0x5fa   : > { %2560 = vmatprep.subr.bf16.mxu1 %v3849_v30  ;;  %v3904_v30 = vld [vmem:[%s5204_s9 + $0x108] ss:$16 sps:$4 sm:$0xff]  }
 0x5fc   : > { %2596 = vmatpush1.bf16.msra.mxu0 %v3826_v7  ;;  %v3883_v7 = vld [vmem:[%s5204_s9 + $0x160] ss:$16 sps:$4 sm:$0xff]  }
 0x5fd   : > { %2597 = vmatprep.subr.bf16.mxu0 %v3834_v16  ;;  %2561 = vmatpush1.bf16.msra.mxu1 %v3847_v35  ;;  %v3891_v16 = vld [vmem:[%s5204_s9 + $0x144] ss:$16 sps:$4 sm:$0xff]  }
 0x5fe   : > { %2562 = vmatprep.subr.bf16.mxu1 %v3855_v37  ;;  %v3912_v35 = vld [vmem:[%s5206_s11 + $0x174] ss:$8 sps:$4 sm:$0xff]  }
 0x600   : > { %2598 = vmatpush1.bf16.msra.mxu0 %v3832_v18  ;;  %v3889_v18 = vld [vmem:[%s5204_s9 + $0x140] ss:$16 sps:$4 sm:$0xff]  }
 0x601   : > { %2599 = vmatprep.subr.bf16.mxu0 %v3840_v20  ;;  %2563 = vmatpush1.bf16.msra.mxu1 %v3853_v6  ;;  %v3897_v20 = vld [vmem:[%s5204_s9 + $0x124] ss:$16 sps:$4 sm:$0xff]  }
 0x604   : > { %2600 = vmatpush1.bf16.msra.mxu0 %v3838_v22  ;;  %v3895_v22 = vld [vmem:[%s5204_s9 + $0x120] ss:$16 sps:$4 sm:$0xff]  }
 0x605   : > { %2601 = vmatprep.subr.bf16.mxu0 %v3846_v26  ;;  %v3903_v26 = vld [vmem:[%s5204_s9 + $0x104] ss:$16 sps:$4 sm:$0xff]  }
 0x608   : > { %2602 = vmatpush1.bf16.msra.mxu0 %v3844_v28  ;;  %v3901_v28 = vld [vmem:[%s5204_s9 + $0x100] ss:$16 sps:$4 sm:$0xff]  }
 0x609   : > { %2603 = vmatprep.subr.bf16.mxu0 %v3852_v31  ;;  %v3909_v31 = vld [vmem:[%s5206_s11 + $0x74] ss:$8 sps:$4 sm:$0xff]  }
 0x60c   : > { %2604 = vmatpush1.bf16.msra.mxu0 %v3850_v36 }
 0x60d   : > { %2605 = vmatprep.subr.bf16.mxu0 %v3858_v38 }
 0x610   : > { %2606 = vmatpush1.bf16.msra.mxu0 %v3856_v8 }
 0x6b3   : > { %v2043_v44 = vpop.f32.mrf.mxu0 }
 0x6b4   : > { %v2052_v48 = vadd.f32 %v4059_v47, %v2043_v44 }
 0x6b5   : > { %v2045_v53 = vpop.f32.mrf.mxu0 }
 0x6b6   : > { %v2053_v54 = vadd.f32 %v4060_v41, %v2045_v53  ;;  %v4733_v55 = vadd.f32 %v2061_v51, %v2052_v48 }
 0x6b7   : > { %v2047_v50 = vpop.f32.mrf.mxu0 }
 0x6b8   : > { %v4735_v39 = vadd.f32 %v2065_v52, %v2053_v54  ;;  %v2054_v57 = vadd.f32 %v4061_v56, %v2047_v50 }
 0x6b9   : > { %v2049_v49 = vpop.f32.mrf.mxu0 }
 0x6ba   : > { %v4738_v58 = vadd.f32 %v2061_v51, %v2054_v57  ;;  %v2055_v46 = vadd.f32 %v4062_v59, %v2049_v49  ;;  %v2074_v45 = vadd.f32 %v4735_v39, %v4733_v55  ;;  %v3861_v49 = vld [vmem:[%s5204_s9 + $0x1e4] ss:$16 sps:$4 sm:$0xff]   ;;  %v3864_v59 = vld [vmem:[%s5204_s9 + $0x1ec] ss:$16 sps:$4 sm:$0xff]  }
 0x6bb   : > { %2564 = vmatprep.subr.bf16.mxu1 %v3861_v49  ;;  %2607 = vmatprep.subr.bf16.mxu0 %v3864_v59 }
 0x6bc   : > { %v4743_v60 = vadd.f32 %v2065_v52, %v2055_v46  ;;  %2075 = vadd.xlane.f32.xlu1 %v2074_v45  ;;  %v2077_v61 = vsel %vm451_vm0, %v4738_v58, 0.0  ;;  %v3859_v46 = vld [vmem:[%s5204_s9 + $0x1e0] ss:$16 sps:$4 sm:$0xff]   ;;  %v3862_v45 = vld [vmem:[%s5204_s9 + $0x1e8] ss:$16 sps:$4 sm:$0xff]  }
 0x6bd   : > { %2565 = vmatpush2.bf16.msra.mxu1 %v3859_v46  ;;  %2608 = vmatpush2.bf16.msra.mxu0 %v3862_v45 }
 0x6be   : > { %v2078_v62 = vsel %vm451_vm0, %v4743_v60, 0.0  ;;  %2609 = vmatprep.subr.bf16.mxu0 %v3870_v0 }
 0x6bf   : > { %v2079_v63 = vadd.f32 %v2078_v62, %v2077_v61  ;;  %v3865_v61 = vld [vmem:[%s5204_s9 + $0x1c0] ss:$16 sps:$4 sm:$0xff]   ;;  %v3867_v62 = vld [vmem:[%s5204_s9 + $0x1c4] ss:$16 sps:$4 sm:$0xff]  }
 0x6c0   : > { %2566 = vmatprep.subr.bf16.mxu1 %v3867_v62 }
 0x6c1   : > { %2080 = vadd.xlane.f32.xlu0 %v2079_v63  ;;  %v3868_v63 = vld [vmem:[%s5204_s9 + $0x1c8] ss:$16 sps:$4 sm:$0xff]   ;;  %2567 = vmatpush2.bf16.msra.mxu1 %v3865_v61 }
 0x6c2   : > { %2610 = vmatpush2.bf16.msra.mxu0 %v3868_v63  ;;  %2568 = vmatprep.subr.bf16.mxu1 %v3873_v1 }
 0x6c3   : > { %2611 = vmatprep.subr.bf16.mxu0 %v3876_v2 }
 0x6c5   : > { %2569 = vmatpush2.bf16.msra.mxu1 %v3871_v5  ;;  %v3918_v5 = vld [vmem:[%s5206_s11 + $0x164] ss:$8 sps:$4 sm:$0xff]  }
 0x6c6   : > { %2612 = vmatpush2.bf16.msra.mxu0 %v3874_v10  ;;  %2570 = vmatprep.subr.bf16.mxu1 %v3879_v11  ;;  %v3913_v10 = vld [vmem:[%s5206_s11 + $0x60] ss:$8 sps:$4 sm:$0xff]  }
 0x6c7   : > { %2613 = vmatprep.subr.bf16.mxu0 %v3882_v13  ;;  %v3916_v11 = vld [vmem:[%s5206_s11 + $0x160] ss:$8 sps:$4 sm:$0xff]   ;;  %v3924_v13 = vld [vmem:[%s5206_s11 + $0x154] ss:$8 sps:$4 sm:$0xff]  }
 0x6c9   : > { %2571 = vmatpush2.bf16.msra.mxu1 %v3877_v12  ;;  %v3921_v12 = vld [vmem:[%s5206_s11 + $0x54] ss:$8 sps:$4 sm:$0xff]  }
 0x6ca   : > { %2614 = vmatpush2.bf16.msra.mxu0 %v3880_v14  ;;  %2572 = vmatprep.subr.bf16.mxu1 %v3885_v3  ;;  %v3919_v14 = vld [vmem:[%s5206_s11 + $0x50] ss:$8 sps:$4 sm:$0xff]  }
 0x6cb   : > { %2615 = vmatprep.subr.bf16.mxu0 %v3888_v4  ;;  %v3922_v3 = vld [vmem:[%s5206_s11 + $0x150] ss:$8 sps:$4 sm:$0xff]   ;;  %v3927_v4 = vld [vmem:[%s5206_s11 + $0x44] ss:$8 sps:$4 sm:$0xff]  }
 0x6cd   : > { %2573 = vmatpush2.bf16.msra.mxu1 %v3883_v7  ;;  %v3930_v7 = vld [vmem:[%s5206_s11 + $0x144] ss:$8 sps:$4 sm:$0xff]  }
 0x6ce   : > { %2616 = vmatpush2.bf16.msra.mxu0 %v3886_v15  ;;  %2574 = vmatprep.subr.bf16.mxu1 %v3891_v16  ;;  %v3925_v15 = vld [vmem:[%s5206_s11 + $0x40] ss:$8 sps:$4 sm:$0xff]  }
 0x6cf   : > { %2617 = vmatprep.subr.bf16.mxu0 %v3894_v17  ;;  %v3928_v16 = vld [vmem:[%s5206_s11 + $0x140] ss:$8 sps:$4 sm:$0xff]   ;;  %v3933_v17 = vld [vmem:[%s5206_s11 + $0x34] ss:$8 sps:$4 sm:$0xff]  }
 0x6d1   : > { %2575 = vmatpush2.bf16.msra.mxu1 %v3889_v18  ;;  %v3936_v18 = vld [vmem:[%s5206_s11 + $0x134] ss:$8 sps:$4 sm:$0xff]  }
 0x6d2   : > { %2618 = vmatpush2.bf16.msra.mxu0 %v3892_v19  ;;  %2576 = vmatprep.subr.bf16.mxu1 %v3897_v20  ;;  %v3931_v19 = vld [vmem:[%s5206_s11 + $0x30] ss:$8 sps:$4 sm:$0xff]  }
 0x6d3   : > { %2619 = vmatprep.subr.bf16.mxu0 %v3900_v21  ;;  %v3934_v20 = vld [vmem:[%s5206_s11 + $0x130] ss:$8 sps:$4 sm:$0xff]   ;;  %v3939_v21 = vld [vmem:[%s5206_s11 + $0x24] ss:$8 sps:$4 sm:$0xff]  }
 0x6d5   : > { %2577 = vmatpush2.bf16.msra.mxu1 %v3895_v22  ;;  %v3942_v22 = vld [vmem:[%s5206_s11 + $0x124] ss:$8 sps:$4 sm:$0xff]  }
 0x6d6   : > { %2620 = vmatpush2.bf16.msra.mxu0 %v3898_v23  ;;  %2578 = vmatprep.subr.bf16.mxu1 %v3903_v26  ;;  %v3937_v23 = vld [vmem:[%s5206_s11 + $0x20] ss:$8 sps:$4 sm:$0xff]  }
 0x6d7   : > { %2621 = vmatprep.subr.bf16.mxu0 %v3906_v27  ;;  %v3940_v26 = vld [vmem:[%s5206_s11 + $0x120] ss:$8 sps:$4 sm:$0xff]   ;;  %v3945_v27 = vld [vmem:[%s5206_s11 + $0x14] ss:$8 sps:$4 sm:$0xff]  }
 0x6d9   : > { %2579 = vmatpush2.bf16.msra.mxu1 %v3901_v28  ;;  %v3948_v28 = vld [vmem:[%s5206_s11 + $0x114] ss:$8 sps:$4 sm:$0xff]  }
 0x6da   : > { %2622 = vmatpush2.bf16.msra.mxu0 %v3904_v30  ;;  %3062 = vmatprep.subr.bf16.mxu1 %v3909_v31  ;;  %v3943_v30 = vld [vmem:[%s5206_s11 + $0x10] ss:$8 sps:$4 sm:$0xff]  }
 0x6db   : > { %3105 = vmatprep.subr.bf16.mxu0 %v3912_v35  ;;  %v3946_v31 = vld [vmem:[%s5206_s11 + $0x110] ss:$8 sps:$4 sm:$0xff]   ;;  %v3951_v35 = vld [vmem:[%s5206_s11 + $0x4] ss:$8 sps:$4 sm:$0xff]  }
 0x745   : > { %v2076_v9 = vpop.xlane.xlu1 %2075 }
 0x746   : > { %v2082_v40 = vmul.f32 0.00390625, %v2076_v9 }
 0x748   : > { %v4846_v42 = vsub.f32 %v4733_v55, %v2082_v40  ;;  %v4849_v43 = vsub.f32 %v4735_v39, %v2082_v40 }
 0x74a   : > { %v2081_v24 = vpop.xlane.xlu0 %2080  ;;  %v2088_v44 = vmul.f32 %v4846_v42, %v4846_v42  ;;  %v2089_v47 = vmul.f32 %v4849_v43, %v4849_v43 }
 0x74b   : > { %v2083_v48 = vmul.f32 0.00390625, %v2081_v24  ;;  %v2072_v24 = vld [vmem:[%s5202_s7] sm:$0x3] }
 0x74c   : > { %v2092_v51 = vadd.f32 %v2089_v47, %v2088_v44  ;;  %v2073_v44 = vld [vmem:[%s5203_s8] sm:$0x3] }
 0x74d   : > { %v4856_v52 = vsub.f32 %v4738_v58, %v2083_v48  ;;  %v4859_v53 = vsub.f32 %v4743_v60, %v2083_v48  ;;  %v2114_v48 = vrot.slane %v2072_v24, %v4403_v34 }
 0x74e   : > { %2093 = vadd.xlane.f32.xlu0 %v2092_v51  ;;  %v2118_v51 = vrot.slane %v2072_v24, %v4400_v33  ;;  %v3963_v24 = vld [vmem:[%s5206_s11 + $0xe4] ss:$8 sps:$4 sm:$0xff]  }
 0x74f   : > { %v2090_v41 = vmul.f32 %v4856_v52, %v4856_v52  ;;  %v2091_v54 = vmul.f32 %v4859_v53, %v4859_v53 }
 0x751   : > { %v2095_v50 = vsel %vm451_vm0, %v2090_v41, 0.0  ;;  %v2096_v56 = vsel %vm451_vm0, %v2091_v54, 0.0 }
 0x752   : > { %v2097_v57 = vadd.f32 %v2096_v56, %v2095_v50  ;;  %v2129_v50 = vrot.slane %v2073_v44, %v4403_v34  ;;  %v2133_v56 = vrot.slane %v2073_v44, %v4400_v33  ;;  %v3966_v44 = vld [vmem:[%s5206_s11 + $0x1e4] ss:$8 sps:$4 sm:$0xff]  }
 0x754   : > { %2098 = vadd.xlane.f32.xlu0 %v2097_v57 }
 0x7d7   : > { %v2094_v36 = vpop.xlane.xlu0 %2093 }
 0x7d8   : > { %v2100_v37 = vmul.f32 0.00390625, %v2094_v36  ;;  %v3954_v36 = vld [vmem:[%s5206_s11 + $0x104] ss:$8 sps:$4 sm:$0xff]  }
 0x7da   : > { %v2102_v38 = vadd.f32 1e-12, %v2100_v37  ;;  %v3949_v37 = vld [vmem:[%s5206_s11] ss:$8 sps:$4 sm:$0xff]  }
 0x7dc   : > { %4039 = vrsqrt.f32 %v2102_v38  ;;  %v3952_v38 = vld [vmem:[%s5206_s11 + $0x100] ss:$8 sps:$4 sm:$0xff]  }
 0x7dd   : > { %v2099_v6 = vpop.xlane.xlu0 %2098 }
 0x7de   : > { %v2101_v8 = vmul.f32 0.00390625, %v2099_v6  ;;  %v3957_v6 = vld [vmem:[%s5206_s11 + $0xf4] ss:$8 sps:$4 sm:$0xff]  }
 0x7e0   : > { %v2103_v9 = vadd.f32 1e-12, %v2101_v8  ;;  %v3960_v8 = vld [vmem:[%s5206_s11 + $0x1f4] ss:$8 sps:$4 sm:$0xff]  }
 0x7e2   : > { %4041 = vrsqrt.f32 %v2103_v9  ;;  %v3955_v9 = vld [vmem:[%s5206_s11 + $0xf0] ss:$8 sps:$4 sm:$0xff]  }
 0x7e9   : > { %v4040_v40 = vpop.eup %4039 }
 0x7ea   : > { %v2107_v47 = vmul.f32 %v4040_v40, %v4849_v43  ;;  %v2106_v41 = vmul.f32 %v4040_v40, %v4846_v42  ;;  %v3907_v42 = vld [vmem:[%s5206_s11 + $0x70] ss:$8 sps:$4 sm:$0xff]  }
 0x7eb   : > { %v3958_v40 = vld [vmem:[%s5206_s11 + $0x1f0] ss:$8 sps:$4 sm:$0xff]  }
 0x7ec   : > { %v2122_v49 = vmul.f32 %v2118_v51, %v2107_v47  ;;  %v2121_v46 = vmul.f32 %v2114_v48, %v2106_v41  ;;  %v3961_v47 = vld [vmem:[%s5206_s11 + $0xe0] ss:$8 sps:$4 sm:$0xff]   ;;  %v3972_v41 = vld [vmem:[%s5206_s11 + $0x1d4] ss:$8 sps:$4 sm:$0xff]  }
 0x7ee   : > { %v2137_v43 = vadd.f32 %v2133_v56, %v2122_v49  ;;  %v2136_v63 = vadd.f32 %v2129_v50, %v2121_v46  ;;  %v3973_v49 = vld [vmem:[%s5206_s11 + $0xc0] ss:$8 sps:$4 sm:$0xff]   ;;  %v3981_v46 = vld [vmem:[%s5206_s11 + $0xb4] ss:$8 sps:$4 sm:$0xff]  }
 0x7ef   : > { %v4042_v54 = vpop.eup %4041 }
 0x7f0   : > { %v2109_v57 = vmul.f32 %v4042_v54, %v4859_v53  ;;  %v2108_v59 = vmul.f32 %v4042_v54, %v4856_v52  ;;  %v3910_v53 = vld [vmem:[%s5206_s11 + $0x170] ss:$8 sps:$4 sm:$0xff]   ;;  %v3915_v52 = vld [vmem:[%s5206_s11 + $0x64] ss:$8 sps:$4 sm:$0xff]  }
 0x7f1   : > { %v3967_v54 = vld [vmem:[%s5206_s11 + $0xd0] ss:$8 sps:$4 sm:$0xff]  }
 0x7f2   : > { %v2124_v45 = vmul.f32 %v2118_v51, %v2109_v57  ;;  %v2123_v61 = vmul.f32 %v2114_v48, %v2108_v59  ;;  %v3964_v48 = vld [vmem:[%s5206_s11 + $0x1e0] ss:$8 sps:$4 sm:$0xff]   ;;  %v3969_v51 = vld [vmem:[%s5206_s11 + $0xd4] ss:$8 sps:$4 sm:$0xff]   ;;  %v3978_v57 = vld [vmem:[%s5206_s11 + $0x1c4] ss:$8 sps:$4 sm:$0xff]  }
 0x7f3   : > { %v3976_v59 = vld [vmem:[%s5206_s11 + $0x1c0] ss:$8 sps:$4 sm:$0xff]  }
 0x7f4   : > { %v2139_v62 = vadd.f32 %v2133_v56, %v2124_v45  ;;  %v2138_v0 = vadd.f32 %v2129_v50, %v2123_v61  ;;  %v3970_v50 = vld [vmem:[%s5206_s11 + $0x1d0] ss:$8 sps:$4 sm:$0xff]   ;;  %v3975_v56 = vld [vmem:[%s5206_s11 + $0xc4] ss:$8 sps:$4 sm:$0xff]   ;;  %v3984_v45 = vld [vmem:[%s5206_s11 + $0x1b4] ss:$8 sps:$4 sm:$0xff]  }
 0x7f5   : > { %v3979_v61 = vld [vmem:[%s5206_s11 + $0xb0] ss:$8 sps:$4 sm:$0xff]  }
 0x7f6   : > { %v2141_v1 = vpack.c.bf16 %v2139_v62, %v2137_v43  ;;  %v2140_v2 = vpack.c.bf16 %v2138_v0, %v2136_v63  ;;  %v3982_v43 = vld [vmem:[%s5206_s11 + $0x1b0] ss:$8 sps:$4 sm:$0xff]   ;;  %v3987_v62 = vld [vmem:[%s5206_s11 + $0xa4] ss:$8 sps:$4 sm:$0xff]   ;;  %v3985_v0 = vld [vmem:[%s5206_s11 + $0xa0] ss:$8 sps:$4 sm:$0xff]  }
 0x7f7   : > { %v3990_v63 = vld [vmem:[%s5206_s11 + $0x1a4] ss:$8 sps:$4 sm:$0xff]  }
 0x7f8   : > { %2580 = vmatprep.mubr.bf16.mxu1 %v2141_v1  ;;  %2623 = vmatprep.mubr.bf16.mxu0 %v2141_v1  ;;  %v3988_v1 = vld [vmem:[%s5206_s11 + $0x1a0] ss:$8 sps:$4 sm:$0xff]  }
 0x7f9   : > { %2581 = vmatmul.mubr.bf16.vlgmr.msra.gmra.mxu1 %v2140_v2  ;;  %2624 = vmatmul.mubr.bf16.vlgmr.msra.gmra.mxu0 %v2140_v2  ;;  %v3993_v2 = vld [vmem:[%s5206_s11 + $0x94] ss:$8 sps:$4 sm:$0xff]  }
 0x7fa   : > { %3063 = vmatpush1.bf16.msra.mxu1 %v3907_v42  ;;  %3106 = vmatpush1.bf16.msra.mxu0 %v3910_v53  ;;  %v3996_v42 = vld [vmem:[%s5206_s11 + $0x194] ss:$8 sps:$4 sm:$0xff]   ;;  %v3991_v53 = vld [vmem:[%s5206_s11 + $0x90] ss:$8 sps:$4 sm:$0xff]  }
 0x7fb   : > { %3064 = vmatprep.subr.bf16.mxu1 %v3915_v52  ;;  %3107 = vmatprep.subr.bf16.mxu0 %v3918_v5  ;;  %v3994_v52 = vld [vmem:[%s5206_s11 + $0x190] ss:$8 sps:$4 sm:$0xff]   ;;  %v3999_v5 = vld [vmem:[%s5206_s11 + $0x84] ss:$8 sps:$4 sm:$0xff]  }
 0x7fe   : > { %3065 = vmatpush1.bf16.msra.mxu1 %v3913_v10  ;;  %3108 = vmatpush1.bf16.msra.mxu0 %v3916_v11  ;;  %v4002_v10 = vld [vmem:[%s5206_s11 + $0x184] ss:$8 sps:$4 sm:$0xff]   ;;  %v3997_v11 = vld [vmem:[%s5206_s11 + $0x80] ss:$8 sps:$4 sm:$0xff]  }
 0x7ff   : > { %3066 = vmatprep.subr.bf16.mxu1 %v3921_v12  ;;  %3109 = vmatprep.subr.bf16.mxu0 %v3924_v13  ;;  %v4000_v12 = vld [vmem:[%s5206_s11 + $0x180] ss:$8 sps:$4 sm:$0xff]  }
 0x800   : > { %v2206_v13 = vld [vmem:[%s5205_s10] sm:$0xf] }
 0x802   : > { %3067 = vmatpush1.bf16.msra.mxu1 %v3919_v14  ;;  %3110 = vmatpush1.bf16.msra.mxu0 %v3922_v3  ;;  %v2211_v14 = vrot.slane %v2206_v13, %v4403_v34  ;;  %v2219_v3 = vrot.slane %v2206_v13, %v626_v25 }
 0x803   : > { %3068 = vmatprep.subr.bf16.mxu1 %v3927_v4  ;;  %3111 = vmatprep.subr.bf16.mxu0 %v3930_v7 }
 0x806   : > { %3069 = vmatpush1.bf16.msra.mxu1 %v3925_v15  ;;  %3112 = vmatpush1.bf16.msra.mxu0 %v3928_v16  ;;  %v2215_v15 = vrot.slane %v2206_v13, %v4400_v33  ;;  %v2223_v16 = vrot.slane %v2206_v13, %v630_v29 }
 0x807   : > { %3070 = vmatprep.subr.bf16.mxu1 %v3933_v17  ;;  %3113 = vmatprep.subr.bf16.mxu0 %v3936_v18 }
 0x80a   : > { %3071 = vmatpush1.bf16.msra.mxu1 %v3931_v19  ;;  %3114 = vmatpush1.bf16.msra.mxu0 %v3934_v20 }
 0x80b   : > { %3072 = vmatprep.subr.bf16.mxu1 %v3939_v21  ;;  %3115 = vmatprep.subr.bf16.mxu0 %v3942_v22 }
 0x80e   : > { %3073 = vmatpush1.bf16.msra.mxu1 %v3937_v23  ;;  %3116 = vmatpush1.bf16.msra.mxu0 %v3940_v26 }
 0x80f   : > { %3074 = vmatprep.subr.bf16.mxu1 %v3945_v27  ;;  %3117 = vmatprep.subr.bf16.mxu0 %v3948_v28 }
 0x812   : > { %3075 = vmatpush1.bf16.msra.mxu1 %v3943_v30  ;;  %3118 = vmatpush1.bf16.msra.mxu0 %v3946_v31 }
 0x813   : > { %3076 = vmatprep.subr.bf16.mxu1 %v3951_v35  ;;  %3119 = vmatprep.subr.bf16.mxu0 %v3954_v36 }
 0x816   : > { %3077 = vmatpush1.bf16.msra.mxu1 %v3949_v37  ;;  %3120 = vmatpush1.bf16.msra.mxu0 %v3952_v38 }
 0x817   : > { %3078 = vmatprep.subr.bf16.mxu1 %v3957_v6  ;;  %3121 = vmatprep.subr.bf16.mxu0 %v3960_v8 }
 0x81a   : > { %3079 = vmatpush2.bf16.msra.mxu1 %v3955_v9  ;;  %3122 = vmatpush2.bf16.msra.mxu0 %v3958_v40 }
 0x81b   : > { %3080 = vmatprep.subr.bf16.mxu1 %v3963_v24  ;;  %3123 = vmatprep.subr.bf16.mxu0 %v3966_v44 }
 0x81e   : > { %3081 = vmatpush2.bf16.msra.mxu1 %v3961_v47  ;;  %3124 = vmatpush2.bf16.msra.mxu0 %v3964_v48 }
 0x81f   : > { %3082 = vmatprep.subr.bf16.mxu1 %v3969_v51  ;;  %3125 = vmatprep.subr.bf16.mxu0 %v3972_v41 }
 0x822   : > { %3083 = vmatpush2.bf16.msra.mxu1 %v3967_v54  ;;  %3126 = vmatpush2.bf16.msra.mxu0 %v3970_v50 }
 0x823   : > { %3084 = vmatprep.subr.bf16.mxu1 %v3975_v56  ;;  %3127 = vmatprep.subr.bf16.mxu0 %v3978_v57 }
 0x826   : > { %3085 = vmatpush2.bf16.msra.mxu1 %v3973_v49  ;;  %3128 = vmatpush2.bf16.msra.mxu0 %v3976_v59 }
 0x827   : > { %3086 = vmatprep.subr.bf16.mxu1 %v3981_v46  ;;  %3129 = vmatprep.subr.bf16.mxu0 %v3984_v45 }
 0x82a   : > { %3087 = vmatpush2.bf16.msra.mxu1 %v3979_v61  ;;  %3130 = vmatpush2.bf16.msra.mxu0 %v3982_v43 }
 0x82b   : > { %3088 = vmatprep.subr.bf16.mxu1 %v3987_v62  ;;  %3131 = vmatprep.subr.bf16.mxu0 %v3990_v63 }
 0x82e   : > { %3089 = vmatpush2.bf16.msra.mxu1 %v3985_v0  ;;  %3132 = vmatpush2.bf16.msra.mxu0 %v3988_v1 }
 0x82f   : > { %3090 = vmatprep.subr.bf16.mxu1 %v3993_v2  ;;  %3133 = vmatprep.subr.bf16.mxu0 %v3996_v42 }
 0x832   : > { %3091 = vmatpush2.bf16.msra.mxu1 %v3991_v53  ;;  %3134 = vmatpush2.bf16.msra.mxu0 %v3994_v52 }
 0x833   : > { %3092 = vmatprep.subr.bf16.mxu1 %v3999_v5  ;;  %3135 = vmatprep.subr.bf16.mxu0 %v4002_v10 }
 0x836   : > { %3093 = vmatpush2.bf16.msra.mxu1 %v3997_v11  ;;  %3136 = vmatpush2.bf16.msra.mxu0 %v4000_v12 }
 0x8b9   : > { %v2582_v4 = vpop.f32.mrf.mxu1  ;;  %v2625_v7 = vpop.f32.mrf.mxu0 }
 0x8ba   : > { %v2583_v17 = vadd.f32 %v2582_v4, %v2211_v14  ;;  %v2626_v18 = vadd.f32 %v2625_v7, %v2219_v3 }
 0x8bb   : > { %v2584_v19 = vpop.f32.mrf.mxu1  ;;  %v2627_v20 = vpop.f32.mrf.mxu0 }
 0x8bc   : > { %v2642_v21 = vmul.f32 0.70710677, %v2583_v17  ;;  %v2644_v22 = vmul.f32 0.70710677, %v2626_v18  ;;  %v2585_v23 = vadd.f32 %v2584_v19, %v2215_v15  ;;  %v2628_v26 = vadd.f32 %v2627_v20, %v2223_v16 }
 0x8bd   : > { %v2586_v27 = vpop.f32.mrf.mxu1  ;;  %v2629_v28 = vpop.f32.mrf.mxu0  ;;  %v2634_v41 = vmul.f32 0.5, %v2583_v17  ;;  %v2636_v52 = vmul.f32 0.5, %v2626_v18  ;;  %v3152_v17 = vld [vmem:[%s5207_s12] sm:$0x3] }
 0x8be   : > { %v2587_v30 = vadd.f32 %v2586_v27, %v2211_v14  ;;  %v2630_v31 = vadd.f32 %v2629_v28, %v2219_v3  ;;  %4043 = verf.f32 %v2642_v21  ;;  %v2643_v25 = vmul.f32 0.70710677, %v2585_v23 }
 0x8bf   : > { %v2588_v35 = vpop.f32.mrf.mxu1  ;;  %v2631_v36 = vpop.f32.mrf.mxu0  ;;  %4045 = verf.f32 %v2644_v22  ;;  %v2645_v37 = vmul.f32 0.70710677, %v2628_v26  ;;  %v2635_v54 = vmul.f32 0.5, %v2585_v23  ;;  %v2637_v1 = vmul.f32 0.5, %v2628_v26 }
 0x8c0   : > { %v2646_v32 = vmul.f32 0.70710677, %v2587_v30  ;;  %4047 = verf.f32 %v2643_v25  ;;  %v2648_v29 = vmul.f32 0.70710677, %v2630_v31  ;;  %v2589_v38 = vadd.f32 %v2588_v35, %v2215_v15 }
 0x8c1   : > { %v2632_v6 = vadd.f32 %v2631_v36, %v2223_v16  ;;  %4049 = verf.f32 %v2645_v37  ;;  %v2638_v46 = vmul.f32 0.5, %v2587_v30  ;;  %v2640_v62 = vmul.f32 0.5, %v2630_v31 }
 0x8c2   : > { %4051 = verf.f32 %v2646_v32  ;;  %v2647_v8 = vmul.f32 0.70710677, %v2589_v38  ;;  %v2639_v63 = vmul.f32 0.5, %v2589_v38  ;;  %v3157_v21 = vrot.slane %v3152_v17, %v4403_v34 }
 0x8c3   : > { %4053 = verf.f32 %v2648_v29  ;;  %v2649_v9 = vmul.f32 0.70710677, %v2632_v6  ;;  %v2641_v42 = vmul.f32 0.5, %v2632_v6  ;;  %v3161_v28 = vrot.slane %v3152_v17, %v4400_v33 }
 0x8c4   : > { %4055 = verf.f32 %v2647_v8 }
 0x8c5   : > { %4057 = verf.f32 %v2649_v9 }
 0x8cb   : > { %v4044_v40 = vpop.eup %4043 }
 0x8cc   : > { %v4046_v24 = vpop.eup %4045  ;;  %v2658_v49 = vadd.f32 1.0, %v4044_v40 }
 0x8cd   : > { %v4048_v44 = vpop.eup %4047  ;;  %v2660_v43 = vadd.f32 1.0, %v4046_v24 }
 0x8ce   : > { %v4050_v47 = vpop.eup %4049  ;;  %v2659_v50 = vadd.f32 1.0, %v4048_v44  ;;  %v2666_v12 = vmul.f32 %v2658_v49, %v2634_v41 }
 0x8cf   : > { %v4052_v48 = vpop.eup %4051  ;;  %v2661_v59 = vadd.f32 1.0, %v4050_v47  ;;  %v2668_v3 = vmul.f32 %v2660_v43, %v2636_v52 }
 0x8d0   : > { %v4054_v51 = vpop.eup %4053  ;;  %v2662_v56 = vadd.f32 1.0, %v4052_v48  ;;  %v2667_v5 = vmul.f32 %v2659_v50, %v2635_v54 }
 0x8d1   : > { %v4056_v57 = vpop.eup %4055  ;;  %v2664_v45 = vadd.f32 1.0, %v4054_v51  ;;  %v2669_v13 = vmul.f32 %v2661_v59, %v2637_v1 }
 0x8d2   : > { %v4058_v61 = vpop.eup %4057  ;;  %v2663_v0 = vadd.f32 1.0, %v4056_v57  ;;  %v2670_v2 = vmul.f32 %v2662_v56, %v2638_v46 }
 0x8d3   : > { %v2665_v53 = vadd.f32 1.0, %v4058_v61  ;;  %v2672_v10 = vmul.f32 %v2664_v45, %v2640_v62 }
 0x8d4   : > { %v2671_v11 = vmul.f32 %v2663_v0, %v2639_v63  ;;  %v2674_v7 = vpack.c.bf16 %v2670_v2, %v2666_v12 }
 0x8d5   : > { %v2673_v14 = vmul.f32 %v2665_v53, %v2641_v42  ;;  %v2676_v16 = vpack.c.bf16 %v2672_v10, %v2668_v3 }
 0x8d6   : > { %v2675_v4 = vpack.c.bf16 %v2671_v11, %v2667_v5 }
 0x8d7   : > { %v2677_v15 = vpack.c.bf16 %v2673_v14, %v2669_v13 }
 0x8d8   : > { %3094 = vmatprep.mubr.bf16.mxu1 %v2675_v4 }
 0x8d9   : > { %3137 = vmatprep.mubr.bf16.mxu0 %v2677_v15  ;;  %3095 = vmatmul.mubr.bf16.vlgmr.msra.gmra.mxu1 %v2674_v7 }
 0x8da   : > { %3138 = vmatmul.mubr.bf16.vlgmr.msra.gmra.mxu0 %v2676_v16 }
 0x999   : > { %v3096_v18 = vpop.f32.mrf.mxu1 }
 0x99a   : > { %v3139_v19 = vpop.f32.mrf.mxu0 }
 0x99b   : > { %v3140_v20 = vadd.f32 %v3139_v19, %v3096_v18  ;;  %v3098_v22 = vpop.f32.mrf.mxu1 }
 0x99c   : > { %v3141_v23 = vpop.f32.mrf.mxu0 }
 0x99d   : > { %v3148_v26 = vadd.f32 %v3140_v20, %v4733_v55  ;;  %v3142_v27 = vadd.f32 %v3141_v23, %v3098_v22  ;;  %v3100_v30 = vpop.f32.mrf.mxu1 }
 0x99e   : > { %v3143_v31 = vpop.f32.mrf.mxu0 }
 0x99f   : > { %v3164_v25 = vadd.f32 %v3157_v21, %v3148_v26  ;;  %v3149_v35 = vadd.f32 %v3142_v27, %v4735_v39  ;;  %v3144_v36 = vadd.f32 %v3143_v31, %v3100_v30  ;;  %v3102_v37 = vpop.f32.mrf.mxu1 }
 0x9a0   : > { %v3145_v34 = vpop.f32.mrf.mxu0 }
 0x9a1   : > { %3168 = vst [vmem:[%s440_s23] sm:$0xff] %v3164_v25  ;;  %v3165_v32 = vadd.f32 %v3161_v28, %v3149_v35  ;;  %v3150_v55 = vadd.f32 %v3144_v36, %v4738_v58  ;;  %v3146_v29 = vadd.f32 %v3145_v34, %v3102_v37 }
 0x9a3   : > { %3169 = vst [vmem:[%s440_s23 + $0x8] sm:$0xff] %v3165_v32  ;;  %v3166_v33 = vadd.f32 %v3157_v21, %v3150_v55  ;;  %v3151_v38 = vadd.f32 %v3146_v29, %v4743_v60 }
 0x9a5   : > { %3170 = vst [vmem:[%s440_s23 + $0x10] sm:$0xf] %v3166_v33  ;;  %v3167_v6 = vadd.f32 %v3161_v28, %v3151_v38 }
 0x9a7   : > { %3171 = vst [vmem:[%s440_s23 + $0x18] sm:$0xf] %v3167_v6 }
 0x9a8 PF: > { %s23_s25 = sadd.s32 1, %s4069_s25  }
 0x9a9   : > { %p20_p4 = scmp.ge.s32.totalorder %s23_s25, 4  }
 0x9ab   :  { %22 = sbr.rel (!%p20_p4) target bundleno = 1 (0x1), region = 102 }

</bundles_post_ra>
